<compile_context>
chip_gen: v7x
topology: tpu7x:2x2x1
jax: 0.10.0
libtpu: 0.0.40
codegen_flags: <defaults>
</compile_context>

<pallas_src>
import math
import jax
import jax.numpy as jnp
from jax.experimental import pallas as pl
from jax.experimental.pallas import tpu as pltpu


# -----------------------------------------------------------------------------
# Fused kernel: texture PCA (streamed) + blendshapes + rotation + projection
# -----------------------------------------------------------------------------
def _fused_forward_kernel(betas_ref, shapedirs_ref, v_template_ref,
                          tex_ref, texdirs_ref, tex_mean_ref,
                          rot_ref, mvp_ref,
                          verts_ref, trans_ref, albedo_ref):
    """Layouts (all lane-dense, planar xyz / planar rgb):
         betas      [1, P_se]       bf16   (whole array, fetched once)
         shapedirs  [P_se, 3*Np]    bf16   (whole array, fetched once)
         v_template [1, 3*Np]       f32    (whole array, fetched once)
         tex        [1, P_tex]      bf16   (whole array, fetched once)
         texdirs    [P_tex, TILE]   bf16   (streamed per grid step, /255 folded)
         tex_mean   [1, TILE]       bf16   (streamed per grid step, /255 folded)
         rot        [9]   f32 SMEM  (row-major 3x3 global rotation)
         mvp        [16]  f32 SMEM  (row-major 4x4 proj*view*rot, y/z rows negated)
       Outputs:
         verts  [1, 3*Np]  f32 planar (rotated FLAME vertices) — written at step 0
         trans  [1, 3*Np]  f32 planar (NDC, y/z already negated) — written at step 0
         albedo [1, TILE]  f32 planar (FLAMETex / 255) — streamed
    """
    # ---- FLAMETex PCA tile: runs every grid step (HBM-bandwidth bound) ------
    albedo_ref[...] = tex_mean_ref[...].astype(jnp.float32) + jnp.dot(
        tex_ref[...], texdirs_ref[...], preferred_element_type=jnp.float32)

    # ---- vertex path: runs once; its operands are never re-fetched ----------
    @pl.when(pl.program_id(0) == 0)
    def _vertex_path():
        n3 = verts_ref.shape[1]
        n = n3 // 3                                  # Np, a multiple of 128

        # FLAME blendshapes: verts = template + [shape, exp] @ dirs   (MXU)
        verts_flat = v_template_ref[...] + jnp.dot(
            betas_ref[...], shapedirs_ref[...],
            preferred_element_type=jnp.float32)
        x = verts_flat[:, 0:n]                       # lane-aligned plane slices
        y = verts_flat[:, n:2 * n]
        z = verts_flat[:, 2 * n:3 * n]

        def r(i, j):                                 # scalar SMEM reads
            return rot_ref[3 * i + j]

        def m(i, j):
            return mvp_ref[4 * i + j]

        # global head rotation (root-rotation approximation of FLAME LBS)
        verts_ref[:, 0:n] = r(0, 0) * x + r(0, 1) * y + r(0, 2) * z
        verts_ref[:, n:2 * n] = r(1, 0) * x + r(1, 1) * y + r(1, 2) * z
        verts_ref[:, 2 * n:3 * n] = r(2, 0) * x + r(2, 1) * y + r(2, 2) * z

        # camera projection: mvp folds rotation and the y/z sign flips
        cx = m(0, 0) * x + m(0, 1) * y + m(0, 2) * z + m(0, 3)
        cy = m(1, 0) * x + m(1, 1) * y + m(1, 2) * z + m(1, 3)
        cz = m(2, 0) * x + m(2, 1) * y + m(2, 2) * z + m(2, 3)
        cw = m(3, 0) * x + m(3, 1) * y + m(3, 2) * z + m(3, 3)
        inv_w = pl.reciprocal(cw, approx=True)       # EUP slot; matches ref (no w guard)
        trans_ref[:, 0:n] = cx * inv_w
        trans_ref[:, n:2 * n] = cy * inv_w
        trans_ref[:, 2 * n:3 * n] = cz * inv_w


def _pick_tile(total, max_tile):
    """Largest lane-tile <= max_tile that is a multiple of 128 and divides total."""
    assert total % 128 == 0, total
    t = min(total, max_tile)
    t -= t % 128
    while total % t != 0:
        t -= 128
    return t


def fused_forward(betas, shapedirs, v_template, tex, texdirs, tex_mean,
                  rot_flat, mvp_flat, *, max_tile_lanes=8192,
                  vmem_limit_bytes=None):
    p_se, n3 = shapedirs.shape
    p_tex, m_tex = texdirs.shape
    tile = _pick_tile(m_tex, max_tile_lanes)
    n_tiles = m_tex // tile
    smem = pltpu.MemorySpace.SMEM

    cost = pl.CostEstimate(
        flops=int(2 * p_se * n3 + 2 * p_tex * m_tex + 18 * n3),
        transcendentals=int(n3 // 3),
        bytes_accessed=int(
            betas.size * betas.dtype.itemsize
            + shapedirs.size * shapedirs.dtype.itemsize
            + v_template.size * v_template.dtype.itemsize
            + tex.size * tex.dtype.itemsize
            + texdirs.size * texdirs.dtype.itemsize
            + tex_mean.size * tex_mean.dtype.itemsize
            + (9 + 16) * 4
            + 2 * n3 * 4 + m_tex * 4))

    return pl.pallas_call(
        _fused_forward_kernel,
        grid=(n_tiles,),
        out_shape=(
            jax.ShapeDtypeStruct((1, n3), jnp.float32),     # vertices  (planar)
            jax.ShapeDtypeStruct((1, n3), jnp.float32),     # projected (planar)
            jax.ShapeDtypeStruct((1, m_tex), jnp.float32),  # albedo    (planar)
        ),
        in_specs=[
            pl.BlockSpec((1, p_se), lambda i: (0, 0)),      # betas      (once)
            pl.BlockSpec((p_se, n3), lambda i: (0, 0)),     # shapedirs  (once)
            pl.BlockSpec((1, n3), lambda i: (0, 0)),        # v_template (once)
            pl.BlockSpec((1, p_tex), lambda i: (0, 0)),     # tex coeffs (once)
            pl.BlockSpec((p_tex, tile), lambda i: (0, i)),  # texdirs    (streamed)
            pl.BlockSpec((1, tile), lambda i: (0, i)),      # tex_mean   (streamed)
            pl.BlockSpec(memory_space=smem),                # rot  [9]
            pl.BlockSpec(memory_space=smem),                # mvp  [16]
        ],
        out_specs=(
            pl.BlockSpec((1, n3), lambda i: (0, 0)),        # resident across grid
            pl.BlockSpec((1, n3), lambda i: (0, 0)),        # resident across grid
            pl.BlockSpec((1, tile), lambda i: (0, i)),      # streamed
        ),
        compiler_params=pltpu.CompilerParams(
            dimension_semantics=("arbitrary",),
            vmem_limit_bytes=vmem_limit_bytes),
        cost_estimate=cost,
    )(betas, shapedirs, v_template, tex, texdirs, tex_mean, rot_flat, mvp_flat)


# -----------------------------------------------------------------------------
# Plain-JAX glue: tiny 3x3 / 4x4 camera math, host-side packing, plumbing
# -----------------------------------------------------------------------------
def rodrigues(rvec):
    theta = jnp.sqrt(jnp.sum(rvec * rvec) + 1e-12)
    k = rvec / theta
    K = jnp.array(
        [[0.0, -k[2], k[1]],
         [k[2], 0.0, -k[0]],
         [-k[1], k[0], 0.0]], dtype=jnp.float32)
    return jnp.eye(3, dtype=jnp.float32) + jnp.sin(theta) * K + (
        1.0 - jnp.cos(theta)) * (K @ K)


def lookat_perspective(aov_deg, eye, target, up=(0.0, 1.0, 0.0),
                       near=0.01, far=10.0, aspect=1.0):
    eye = jnp.asarray(eye, jnp.float32)
    target = jnp.asarray(target, jnp.float32)
    up = jnp.asarray(up, jnp.float32)
    f = target - eye
    f = f / jnp.linalg.norm(f)
    s = jnp.cross(f, up)
    s = s / jnp.linalg.norm(s)
    u = jnp.cross(s, f)
    view = jnp.stack([
        jnp.concatenate([s, -jnp.dot(s, eye)[None]]),
        jnp.concatenate([u, -jnp.dot(u, eye)[None]]),
        jnp.concatenate([-f, jnp.dot(f, eye)[None]]),
        jnp.array([0.0, 0.0, 0.0, 1.0], jnp.float32),
    ])
    fy = 1.0 / math.tan(math.radians(aov_deg) / 2.0)
    fx = fy / aspect
    proj = jnp.array(
        [[fx, 0.0, 0.0, 0.0],
         [0.0, fy, 0.0, 0.0],
         [0.0, 0.0, -(far + near) / (far - near), -2.0 * far * near / (far - near)],
         [0.0, 0.0, -1.0, 0.0]], dtype=jnp.float32)
    return proj @ view


def build_transforms(pose, cam_eye):
    """Returns (R 3x3 global rotation, mvp 4x4 = proj @ view @ R), unfolded."""
    pose_c = jnp.concatenate(
        [jnp.clip(pose[:, :3], -0.1, 0.1),
         jnp.clip(pose[:, 3:4], 0.0, 0.5),     # jaw — clamped, unused (see TODO)
         jnp.clip(pose[:, 4:], -0.02, 0.02)], axis=1)
    R = rodrigues(pose_c[0, :3])
    R4 = jnp.eye(4, dtype=jnp.float32).at[:3, :3].set(R)
    mvp = lookat_perspective(15.0, cam_eye, (0.0, 0.0, 0.0)) @ R4
    return R, mvp


def _round_up(x, m):
    return (x + m - 1) // m * m


def pack_model(v_template_nat, shapedirs_nat, tex_mean_planar, texdirs_planar,
               tex_h, tex_w, cam_eye):
    """One-time host-side packing: pad N to a multiple of 128 and store bases
    planar-xyz / planar-rgb, lane-dense, bf16 where bandwidth matters."""
    n = v_template_nat.shape[0]
    n_pad = _round_up(n, 128)
    p_se = shapedirs_nat.shape[2]

    vt = jnp.zeros((n_pad, 3), jnp.float32).at[:n].set(v_template_nat)
    v_template = vt.T.reshape(1, 3 * n_pad)                       # f32 (small)

    sd = jnp.zeros((n_pad, 3, p_se), jnp.float32).at[:n].set(
        shapedirs_nat.astype(jnp.float32))
    shapedirs = sd.transpose(2, 1, 0).reshape(p_se, 3 * n_pad).astype(jnp.bfloat16)

    return {
        "n_verts": n, "n_pad": n_pad, "tex_h": tex_h, "tex_w": tex_w,
        "v_template": v_template,
        "shapedirs": shapedirs,
        "tex_mean": (tex_mean_planar / 255.0).astype(jnp.bfloat16),   # /255 folded
        "texdirs": (texdirs_planar / 255.0).astype(jnp.bfloat16),     # /255 folded
        "cam_eye": cam_eye,
    }


def face_camera_forward(params, model):
    """Pallas implementation of FaceCameraModel.forward (up to the renderer)."""
    n, n_pad = model["n_verts"], model["n_pad"]

    R, mvp = build_transforms(params["pose"], model["cam_eye"])
    # Fold the module's y/z negation of projected vertices into mvp rows 1, 2.
    flip = jnp.array([1.0, -1.0, -1.0, 1.0], jnp.float32)
    mvp_folded = mvp * flip[:, None]

    betas = jnp.concatenate([params["shape"], params["exp"]],
                            axis=1).astype(model["shapedirs"].dtype)
    tex_c = params["tex"].astype(model["texdirs"].dtype)

    verts_flat, trans_flat, albedo_flat = fused_forward(
        betas, model["shapedirs"], model["v_template"],
        tex_c, model["texdirs"], model["tex_mean"],
        R.reshape(9), mvp_folded.reshape(16))

    # module-facing layouts (tiny reshapes + un-padding outside the kernel)
    verts = verts_flat.reshape(3, n_pad)[:, :n].T[None]             # [1, N, 3]
    trans_vertices = trans_flat.reshape(3, n_pad)[:, :n].T[None]    # [1, N, 3]
    albedos = albedo_flat.reshape(1, 3, model["tex_h"], model["tex_w"])

    # SH lighting scaling: 27 floats — plain JAX, never worth a kernel launch
    sh_full = jnp.concatenate([params["sh_coef"], jnp.zeros((5,), jnp.float32)])
    lights_scaled = params["lights"] * sh_full[None, :, None]

    # TODO(synk): `self.render` (differentiable mesh rasterizer) and FLAME's
    # full LBS (joint regressor, pose/jaw blendshapes, skinning) have no clean
    # Pallas equivalent; only the global rotation from pose[:3] is applied and
    # the renderer inputs are returned instead of (image, alpha).
    return verts, trans_vertices, albedos, lights_scaled


if __name__ == "__main__":
    SHAPE_P, EXP_P, TEX_P = 16, 16, 16
    N_VERTS = 123                 # deliberately NOT a multiple of 128 -> padded to 128
    TEX_H = TEX_W = 64            # 3*H*W = 12288 lanes -> multi-step streamed grid

    key = jax.random.PRNGKey(0)
    ks = jax.random.split(key, 10)

    # deterministic synthetic "FLAME"/"FLAMETex" weights in natural layouts
    v_template_nat = jax.random.normal(ks[0], (N_VERTS, 3), jnp.float32) * 0.1
    shapedirs_nat = jax.random.normal(
        ks[1], (N_VERTS, 3, SHAPE_P + EXP_P), jnp.float32) * 0.01
    tex_mean_planar = 128.0 + jax.random.normal(
        ks[2], (1, 3 * TEX_H * TEX_W), jnp.float32) * 10.0
    texdirs_planar = jax.random.normal(
        ks[3], (TEX_P, 3 * TEX_H * TEX_W), jnp.float32) * 5.0

    model = pack_model(v_template_nat, shapedirs_nat, tex_mean_planar,
                       texdirs_planar, TEX_H, TEX_W, cam_eye=(0.0, 0.0, -1.5))

    params = {
        "shape": jax.random.normal(ks[4], (1, SHAPE_P), jnp.float32) * 0.6,
        "tex": jax.random.normal(ks[5], (1, TEX_P), jnp.float32) * 0.5,
        "exp": jax.random.normal(ks[6], (1, EXP_P), jnp.float32),
        "pose": jnp.concatenate(
            [jax.random.normal(ks[7], (1, 3), jnp.float32) * 0.1,
             jnp.clip(jax.random.uniform(ks[8], (1, 1)) * 0.7 - 0.2, 0.0),
             jax.random.normal(ks[9], (1, 2), jnp.float32) * 0.02], axis=1),
        "sh_coef": jnp.array([2.0, 0.1, 0.1, 0.1], jnp.float32),
        "lights": jnp.ones((1, 9, 3), jnp.float32),
    }

    outs = jax.block_until_ready(face_camera_forward(params, model))
    verts, trans_vertices, albedos, lights_scaled = outs

    assert verts.shape == (1, N_VERTS, 3)
    assert trans_vertices.shape == (1, N_VERTS, 3)
    assert albedos.shape == (1, 3, TEX_H, TEX_W)
    assert lights_scaled.shape == (1, 9, 3)

    # ---- numerical check against plain JAX (same bf16 quantization) ---------
    betas_q = jnp.concatenate([params["shape"], params["exp"]], axis=1
                              ).astype(jnp.bfloat16).astype(jnp.float32)
    sd_q = shapedirs_nat.astype(jnp.bfloat16).astype(jnp.float32)
    ref_base = v_template_nat + jnp.einsum("ncp,p->nc", sd_q, betas_q[0])   # [N,3]

    R, mvp = build_transforms(params["pose"], model["cam_eye"])
    ref_verts = (ref_base @ R.T)[None]                                      # [1,N,3]
    hom = jnp.concatenate([ref_base, jnp.ones((N_VERTS, 1), jnp.float32)], axis=1)
    clip = hom @ mvp.T
    ndc = clip[:, :3] / clip[:, 3:4]
    ref_trans = (ndc * jnp.array([1.0, -1.0, -1.0], jnp.float32))[None]

    tex_q = params["tex"].astype(jnp.bfloat16).astype(jnp.float32)
    ref_albedo = ((tex_mean_planar / 255.0).astype(jnp.bfloat16).astype(jnp.float32)
                  + tex_q @ (texdirs_planar / 255.0).astype(jnp.bfloat16
                                                            ).astype(jnp.float32)
                  ).reshape(1, 3, TEX_H, TEX_W)

    assert bool(jnp.allclose(verts, ref_verts, rtol=2e-2, atol=2e-3))
    assert bool(jnp.allclose(trans_vertices, ref_trans, rtol=2e-2, atol=2e-3))
    assert bool(jnp.allclose(albedos, ref_albedo, rtol=2e-2, atol=2e-3))

    print("KERNEL_OK")
</pallas_src>

<mosaic_0001>
module attributes {stable_mosaic.version = 11 : i64} {
  func.func @_fused_forward_kernel(%arg0: i32, %arg1: memref<1x32xbf16, #tpu.memory_space<vmem>>, %arg2: memref<32x384xbf16, #tpu.memory_space<vmem>>, %arg3: memref<1x384xf32, #tpu.memory_space<vmem>>, %arg4: memref<1x16xbf16, #tpu.memory_space<vmem>>, %arg5: memref<16x6144xbf16, #tpu.memory_space<vmem>>, %arg6: memref<1x6144xbf16, #tpu.memory_space<vmem>>, %arg7: memref<9xf32, #tpu.memory_space<smem>>, %arg8: memref<16xf32, #tpu.memory_space<smem>>, %arg9: memref<1x384xf32, #tpu.memory_space<vmem>>, %arg10: memref<1x384xf32, #tpu.memory_space<vmem>>, %arg11: memref<1x6144xf32, #tpu.memory_space<vmem>>) attributes {dimension_semantics = [#tpu.dimension_semantics<arbitrary>], iteration_bounds = array<i64: 2>, scalar_prefetch = 0 : i64, scratch_operands = 0 : i64, tpu.core_type = #tpu.core_type<tc>, window_params = [{pipeline_mode = #tpu.pipeline_mode<synchronous>, transform_indices = @transform_0, window_bounds = array<i64: 1, 32>}, {pipeline_mode = #tpu.pipeline_mode<synchronous>, transform_indices = @transform_1, window_bounds = array<i64: 32, 384>}, {pipeline_mode = #tpu.pipeline_mode<synchronous>, transform_indices = @transform_2, window_bounds = array<i64: 1, 384>}, {pipeline_mode = #tpu.pipeline_mode<synchronous>, transform_indices = @transform_3, window_bounds = array<i64: 1, 16>}, {transform_indices = @transform_4, window_bounds = array<i64: 16, 6144>}, {transform_indices = @transform_5, window_bounds = array<i64: 1, 6144>}, {transform_indices = @transform_6, window_bounds = array<i64: 9>}, {transform_indices = @transform_7, window_bounds = array<i64: 16>}, {pipeline_mode = #tpu.pipeline_mode<synchronous>, transform_indices = @transform_8, window_bounds = array<i64: 1, 384>}, {pipeline_mode = #tpu.pipeline_mode<synchronous>, transform_indices = @transform_9, window_bounds = array<i64: 1, 384>}, {transform_indices = @transform_10, window_bounds = array<i64: 1, 6144>}]} {
    %c0 = arith.constant 0 : index
    %c0_0 = arith.constant 0 : index
    %0 = vector.load %arg6[%c0, %c0_0] : memref<1x6144xbf16, #tpu.memory_space<vmem>>, vector<1x6144xbf16>
    %1 = arith.extf %0 : vector<1x6144xbf16> to vector<1x6144xf32>
    %c0_1 = arith.constant 0 : index
    %c0_2 = arith.constant 0 : index
    %2 = vector.load %arg4[%c0_1, %c0_2] : memref<1x16xbf16, #tpu.memory_space<vmem>>, vector<1x16xbf16>
    %c0_3 = arith.constant 0 : index
    %c0_4 = arith.constant 0 : index
    %3 = vector.load %arg5[%c0_3, %c0_4] : memref<16x6144xbf16, #tpu.memory_space<vmem>>, vector<16x6144xbf16>
    %cst = arith.constant dense<0.000000e+00> : vector<1x6144xf32>
    %4 = tpu.matmul %2, %3, %cst {dimension_numbers = #tpu.dot_dimension_numbers<[1], [0], [0], [1], [0, 0, 1, 1], [], []>} : vector<1x16xbf16>, vector<16x6144xbf16>, vector<1x6144xf32> -> vector<1x6144xf32>
    %5 = arith.addf %1, %4 : vector<1x6144xf32>
    %c0_5 = arith.constant 0 : index
    %c0_6 = arith.constant 0 : index
    %6 = vector.load %arg11[%c0_5, %c0_6] : memref<1x6144xf32, #tpu.memory_space<vmem>>, vector<1x6144xf32>
    tpu.vector_store %arg11[%c0_5, %c0_6], %5 {strides = array<i32>} : memref<1x6144xf32, #tpu.memory_space<vmem>>, vector<1x6144xf32>,
    %c0_i32 = arith.constant 0 : i32
    %7 = arith.cmpi eq, %arg0, %c0_i32 : i32
    %8 = arith.extui %7 : i1 to i32
    %c0_i32_7 = arith.constant 0 : i32
    %9 = arith.cmpi ne, %8, %c0_i32_7 : i32
    scf.if %9 {
      %c0_8 = arith.constant 0 : index
      %c0_9 = arith.constant 0 : index
      %10 = vector.load %arg3[%c0_8, %c0_9] : memref<1x384xf32, #tpu.memory_space<vmem>>, vector<1x384xf32>
      %c0_10 = arith.constant 0 : index
      %c0_11 = arith.constant 0 : index
      %11 = vector.load %arg1[%c0_10, %c0_11] : memref<1x32xbf16, #tpu.memory_space<vmem>>, vector<1x32xbf16>
      %c0_12 = arith.constant 0 : index
      %c0_13 = arith.constant 0 : index
      %12 = vector.load %arg2[%c0_12, %c0_13] : memref<32x384xbf16, #tpu.memory_space<vmem>>, vector<32x384xbf16>
      %cst_14 = arith.constant dense<0.000000e+00> : vector<1x384xf32>
      %13 = tpu.matmul %11, %12, %cst_14 {dimension_numbers = #tpu.dot_dimension_numbers<[1], [0], [0], [1], [0, 0, 1, 1], [], []>} : vector<1x32xbf16>, vector<32x384xbf16>, vector<1x384xf32> -> vector<1x384xf32>
      %14 = arith.addf %10, %13 : vector<1x384xf32>
      %15 = vector.extract_strided_slice %14 {offsets = [0, 0], sizes = [1, 128], strides = [1, 1]} : vector<1x384xf32> to vector<1x128xf32>
      %16 = vector.extract_strided_slice %14 {offsets = [0, 128], sizes = [1, 128], strides = [1, 1]} : vector<1x384xf32> to vector<1x128xf32>
      %17 = vector.extract_strided_slice %14 {offsets = [0, 256], sizes = [1, 128], strides = [1, 1]} : vector<1x384xf32> to vector<1x128xf32>
      %c0_15 = arith.constant 0 : index
      %18 = memref.load %arg7[%c0_15] : memref<9xf32, #tpu.memory_space<smem>>
      %19 = vector.broadcast %18 : f32 to vector<1x128xf32>
      %20 = arith.mulf %19, %15 : vector<1x128xf32>
      %c1 = arith.constant 1 : index
      %21 = memref.load %arg7[%c1] : memref<9xf32, #tpu.memory_space<smem>>
      %22 = vector.broadcast %21 : f32 to vector<1x128xf32>
      %23 = arith.mulf %22, %16 : vector<1x128xf32>
      %24 = arith.addf %20, %23 : vector<1x128xf32>
      %c2 = arith.constant 2 : index
      %25 = memref.load %arg7[%c2] : memref<9xf32, #tpu.memory_space<smem>>
      %26 = vector.broadcast %25 : f32 to vector<1x128xf32>
      %27 = arith.mulf %26, %17 : vector<1x128xf32>
      %28 = arith.addf %24, %27 : vector<1x128xf32>
      %c0_16 = arith.constant 0 : index
      %c0_17 = arith.constant 0 : index
      %29 = vector.load %arg9[%c0_16, %c0_17] : memref<1x384xf32, #tpu.memory_space<vmem>>, vector<1x128xf32>
      tpu.vector_store %arg9[%c0_16, %c0_17], %28 {strides = array<i32>} : memref<1x384xf32, #tpu.memory_space<vmem>>, vector<1x128xf32>,
      %c3 = arith.constant 3 : index
      %30 = memref.load %arg7[%c3] : memref<9xf32, #tpu.memory_space<smem>>
      %31 = vector.broadcast %30 : f32 to vector<1x128xf32>
      %32 = arith.mulf %31, %15 : vector<1x128xf32>
      %c4 = arith.constant 4 : index
      %33 = memref.load %arg7[%c4] : memref<9xf32, #tpu.memory_space<smem>>
      %34 = vector.broadcast %33 : f32 to vector<1x128xf32>
      %35 = arith.mulf %34, %16 : vector<1x128xf32>
      %36 = arith.addf %32, %35 : vector<1x128xf32>
      %c5 = arith.constant 5 : index
      %37 = memref.load %arg7[%c5] : memref<9xf32, #tpu.memory_space<smem>>
      %38 = vector.broadcast %37 : f32 to vector<1x128xf32>
      %39 = arith.mulf %38, %17 : vector<1x128xf32>
      %40 = arith.addf %36, %39 : vector<1x128xf32>
      %c0_18 = arith.constant 0 : index
      %c128 = arith.constant 128 : index
      %41 = vector.load %arg9[%c0_18, %c128] : memref<1x384xf32, #tpu.memory_space<vmem>>, vector<1x128xf32>
      tpu.vector_store %arg9[%c0_18, %c128], %40 {strides = array<i32>} : memref<1x384xf32, #tpu.memory_space<vmem>>, vector<1x128xf32>,
      %c6 = arith.constant 6 : index
      %42 = memref.load %arg7[%c6] : memref<9xf32, #tpu.memory_space<smem>>
      %43 = vector.broadcast %42 : f32 to vector<1x128xf32>
      %44 = arith.mulf %43, %15 : vector<1x128xf32>
      %c7 = arith.constant 7 : index
      %45 = memref.load %arg7[%c7] : memref<9xf32, #tpu.memory_space<smem>>
      %46 = vector.broadcast %45 : f32 to vector<1x128xf32>
      %47 = arith.mulf %46, %16 : vector<1x128xf32>
      %48 = arith.addf %44, %47 : vector<1x128xf32>
      %c8 = arith.constant 8 : index
      %49 = memref.load %arg7[%c8] : memref<9xf32, #tpu.memory_space<smem>>
      %50 = vector.broadcast %49 : f32 to vector<1x128xf32>
      %51 = arith.mulf %50, %17 : vector<1x128xf32>
      %52 = arith.addf %48, %51 : vector<1x128xf32>
      %c0_19 = arith.constant 0 : index
      %c256 = arith.constant 256 : index
      %53 = vector.load %arg9[%c0_19, %c256] : memref<1x384xf32, #tpu.memory_space<vmem>>, vector<1x128xf32>
      tpu.vector_store %arg9[%c0_19, %c256], %52 {strides = array<i32>} : memref<1x384xf32, #tpu.memory_space<vmem>>, vector<1x128xf32>,
      %c0_20 = arith.constant 0 : index
      %54 = memref.load %arg8[%c0_20] : memref<16xf32, #tpu.memory_space<smem>>
      %55 = vector.broadcast %54 : f32 to vector<1x128xf32>
      %56 = arith.mulf %55, %15 : vector<1x128xf32>
      %c1_21 = arith.constant 1 : index
      %57 = memref.load %arg8[%c1_21] : memref<16xf32, #tpu.memory_space<smem>>
      %58 = vector.broadcast %57 : f32 to vector<1x128xf32>
      %59 = arith.mulf %58, %16 : vector<1x128xf32>
      %60 = arith.addf %56, %59 : vector<1x128xf32>
      %c2_22 = arith.constant 2 : index
      %61 = memref.load %arg8[%c2_22] : memref<16xf32, #tpu.memory_space<smem>>
      %62 = vector.broadcast %61 : f32 to vector<1x128xf32>
      %63 = arith.mulf %62, %17 : vector<1x128xf32>
      %64 = arith.addf %60, %63 : vector<1x128xf32>
      %c3_23 = arith.constant 3 : index
      %65 = memref.load %arg8[%c3_23] : memref<16xf32, #tpu.memory_space<smem>>
      %66 = vector.broadcast %65 : f32 to vector<1x128xf32>
      %67 = arith.addf %64, %66 : vector<1x128xf32>
      %c4_24 = arith.constant 4 : index
      %68 = memref.load %arg8[%c4_24] : memref<16xf32, #tpu.memory_space<smem>>
      %69 = vector.broadcast %68 : f32 to vector<1x128xf32>
      %70 = arith.mulf %69, %15 : vector<1x128xf32>
      %c5_25 = arith.constant 5 : index
      %71 = memref.load %arg8[%c5_25] : memref<16xf32, #tpu.memory_space<smem>>
      %72 = vector.broadcast %71 : f32 to vector<1x128xf32>
      %73 = arith.mulf %72, %16 : vector<1x128xf32>
      %74 = arith.addf %70, %73 : vector<1x128xf32>
      %c6_26 = arith.constant 6 : index
      %75 = memref.load %arg8[%c6_26] : memref<16xf32, #tpu.memory_space<smem>>
      %76 = vector.broadcast %75 : f32 to vector<1x128xf32>
      %77 = arith.mulf %76, %17 : vector<1x128xf32>
      %78 = arith.addf %74, %77 : vector<1x128xf32>
      %c7_27 = arith.constant 7 : index
      %79 = memref.load %arg8[%c7_27] : memref<16xf32, #tpu.memory_space<smem>>
      %80 = vector.broadcast %79 : f32 to vector<1x128xf32>
      %81 = arith.addf %78, %80 : vector<1x128xf32>
      %c8_28 = arith.constant 8 : index
      %82 = memref.load %arg8[%c8_28] : memref<16xf32, #tpu.memory_space<smem>>
      %83 = vector.broadcast %82 : f32 to vector<1x128xf32>
      %84 = arith.mulf %83, %15 : vector<1x128xf32>
      %c9 = arith.constant 9 : index
      %85 = memref.load %arg8[%c9] : memref<16xf32, #tpu.memory_space<smem>>
      %86 = vector.broadcast %85 : f32 to vector<1x128xf32>
      %87 = arith.mulf %86, %16 : vector<1x128xf32>
      %88 = arith.addf %84, %87 : vector<1x128xf32>
      %c10 = arith.constant 10 : index
      %89 = memref.load %arg8[%c10] : memref<16xf32, #tpu.memory_space<smem>>
      %90 = vector.broadcast %89 : f32 to vector<1x128xf32>
      %91 = arith.mulf %90, %17 : vector<1x128xf32>
      %92 = arith.addf %88, %91 : vector<1x128xf32>
      %c11 = arith.constant 11 : index
      %93 = memref.load %arg8[%c11] : memref<16xf32, #tpu.memory_space<smem>>
      %94 = vector.broadcast %93 : f32 to vector<1x128xf32>
      %95 = arith.addf %92, %94 : vector<1x128xf32>
      %c12 = arith.constant 12 : index
      %96 = memref.load %arg8[%c12] : memref<16xf32, #tpu.memory_space<smem>>
      %97 = vector.broadcast %96 : f32 to vector<1x128xf32>
      %98 = arith.mulf %97, %15 : vector<1x128xf32>
      %c13 = arith.constant 13 : index
      %99 = memref.load %arg8[%c13] : memref<16xf32, #tpu.memory_space<smem>>
      %100 = vector.broadcast %99 : f32 to vector<1x128xf32>
      %101 = arith.mulf %100, %16 : vector<1x128xf32>
      %102 = arith.addf %98, %101 : vector<1x128xf32>
      %c14 = arith.constant 14 : index
      %103 = memref.load %arg8[%c14] : memref<16xf32, #tpu.memory_space<smem>>
      %104 = vector.broadcast %103 : f32 to vector<1x128xf32>
      %105 = arith.mulf %104, %17 : vector<1x128xf32>
      %106 = arith.addf %102, %105 : vector<1x128xf32>
      %c15 = arith.constant 15 : index
      %107 = memref.load %arg8[%c15] : memref<16xf32, #tpu.memory_space<smem>>
      %108 = vector.broadcast %107 : f32 to vector<1x128xf32>
      %109 = arith.addf %106, %108 : vector<1x128xf32>
      %110 = tpu.reciprocal %109 {approx = true} : vector<1x128xf32> -> vector<1x128xf32>
      %111 = arith.mulf %67, %110 : vector<1x128xf32>
      %c0_29 = arith.constant 0 : index
      %c0_30 = arith.constant 0 : index
      %112 = vector.load %arg10[%c0_29, %c0_30] : memref<1x384xf32, #tpu.memory_space<vmem>>, vector<1x128xf32>
      tpu.vector_store %arg10[%c0_29, %c0_30], %111 {strides = array<i32>} : memref<1x384xf32, #tpu.memory_space<vmem>>, vector<1x128xf32>,
      %113 = arith.mulf %81, %110 : vector<1x128xf32>
      %c0_31 = arith.constant 0 : index
      %c128_32 = arith.constant 128 : index
      %114 = vector.load %arg10[%c0_31, %c128_32] : memref<1x384xf32, #tpu.memory_space<vmem>>, vector<1x128xf32>
      tpu.vector_store %arg10[%c0_31, %c128_32], %113 {strides = array<i32>} : memref<1x384xf32, #tpu.memory_space<vmem>>, vector<1x128xf32>,
      %115 = arith.mulf %95, %110 : vector<1x128xf32>
      %c0_33 = arith.constant 0 : index
      %c256_34 = arith.constant 256 : index
      %116 = vector.load %arg10[%c0_33, %c256_34] : memref<1x384xf32, #tpu.memory_space<vmem>>, vector<1x128xf32>
      tpu.vector_store %arg10[%c0_33, %c256_34], %115 {strides = array<i32>} : memref<1x384xf32, #tpu.memory_space<vmem>>, vector<1x128xf32>,
    } else {
    }
    return
  }
  func.func @transform_0(%arg0: i32) -> (i32, i32) {
    %c0_i32 = arith.constant 0 : i32
    %c0_i32_0 = arith.constant 0 : i32
    %c0_i32_1 = arith.constant 0 : i32
    return %c0_i32, %c0_i32_0 : i32, i32
  }
  func.func @transform_1(%arg0: i32) -> (i32, i32) {
    %c0_i32 = arith.constant 0 : i32
    %c0_i32_0 = arith.constant 0 : i32
    %c0_i32_1 = arith.constant 0 : i32
    return %c0_i32, %c0_i32_0 : i32, i32
  }
  func.func @transform_2(%arg0: i32) -> (i32, i32) {
    %c0_i32 = arith.constant 0 : i32
    %c0_i32_0 = arith.constant 0 : i32
    %c0_i32_1 = arith.constant 0 : i32
    return %c0_i32, %c0_i32_0 : i32, i32
  }
  func.func @transform_3(%arg0: i32) -> (i32, i32) {
    %c0_i32 = arith.constant 0 : i32
    %c0_i32_0 = arith.constant 0 : i32
    %c0_i32_1 = arith.constant 0 : i32
    return %c0_i32, %c0_i32_0 : i32, i32
  }
  func.func @transform_4(%arg0: i32) -> (i32, i32) {
    %c0_i32 = arith.constant 0 : i32
    %c0_i32_0 = arith.constant 0 : i32
    return %c0_i32, %arg0 : i32, i32
  }
  func.func @transform_5(%arg0: i32) -> (i32, i32) {
    %c0_i32 = arith.constant 0 : i32
    %c0_i32_0 = arith.constant 0 : i32
    return %c0_i32, %arg0 : i32, i32
  }
  func.func @transform_6(%arg0: i32) -> i32 {
    %c0_i32 = arith.constant 0 : i32
    %c0_i32_0 = arith.constant 0 : i32
    return %c0_i32 : i32
  }
  func.func @transform_7(%arg0: i32) -> i32 {
    %c0_i32 = arith.constant 0 : i32
    %c0_i32_0 = arith.constant 0 : i32
    return %c0_i32 : i32
  }
  func.func @transform_8(%arg0: i32) -> (i32, i32) {
    %c0_i32 = arith.constant 0 : i32
    %c0_i32_0 = arith.constant 0 : i32
    %c0_i32_1 = arith.constant 0 : i32
    return %c0_i32, %c0_i32_0 : i32, i32
  }
  func.func @transform_9(%arg0: i32) -> (i32, i32) {
    %c0_i32 = arith.constant 0 : i32
    %c0_i32_0 = arith.constant 0 : i32
    %c0_i32_1 = arith.constant 0 : i32
    return %c0_i32, %c0_i32_0 : i32, i32
  }
  func.func @transform_10(%arg0: i32) -> (i32, i32) {
    %c0_i32 = arith.constant 0 : i32
    %c0_i32_0 = arith.constant 0 : i32
    return %c0_i32, %arg0 : i32, i32
  }
}

</mosaic_0001>

<bundles_post_ra>
// kernel: tpu_custom_call.1
= control target key start
LH: loop header
LB: loop body
LE: loop exit
PB: predicated region body
PF: predicated region fallthrough
CT: control target
= control target key end

     0   :  { %s3859_s0 = inlined_call_operand.hbm [shape: bf16[1,32], index: 0, kind: input, shape index: {}]   ;;  %s3860_s1 = inlined_call_operand.hbm [shape: bf16[32,384], index: 1, kind: input, shape index: {}]   ;;  %s3861_s2 = inlined_call_operand.vmem [shape: f32[1,384], index: 2, kind: input, shape index: {}]   ;;  %s3862_s3 = inlined_call_operand.vmem [shape: bf16[1,16], index: 3, kind: input, shape index: {}]   ;;  %s3863_s4 = inlined_call_operand.hbm [shape: bf16[16,12288], index: 4, kind: input, shape index: {}]   ;;  %s3864_s5 = inlined_call_operand.hbm [shape: bf16[1,12288], index: 5, kind: input, shape index: {}]   ;;  %s3865_s6 = inlined_call_operand.vmem [shape: f32[9], index: 6, kind: input, shape index: {}]   ;;  %s3866_s7 = inlined_call_operand.vmem [shape: f32[16], index: 7, kind: input, shape index: {}]   ;;  %s3867_s8 = inlined_call_operand.hbm [shape: f32[1,384], index: 8, kind: output, shape index: {0}]   ;;  %s3868_s9 = inlined_call_operand.hbm [shape: f32[1,384], index: 9, kind: output, shape index: {1}]   ;;  %s3869_s10 = inlined_call_operand.hbm [shape: f32[1,12288], index: 10, kind: output, shape index: {2}]  }
   0x1   :  { %3889 = sst [smem:[#allocation29_spill]] %s3859_s0 }
   0x2   :  { %3890 = sst [smem:[#allocation30_spill]] %s3863_s4 }
   0x3   :  { %3891 = sst [smem:[#allocation31_spill]] %s3868_s9 }
   0x4   :  { %3892 = sst [smem:[#allocation32_spill]] %s3869_s10 }
   0x5   :  { %16 = vsyncpa [#allocation3], 0 }
   0x6   :  { %17 = vsyncpa [#allocation7], 0 }
   0x7   :  { %18 = vsyncpa [#allocation5], 0 }
   0x8   :  { %19 = vsyncpa [#allocation12], 0 }
   0x9   :  { %20 = vsyncpa [#allocation4], 0 }
   0xa   :  { %21 = vsyncpa [#allocation15], 0  ;;  %s3237_s13 = smov 0   ;;  %s3239_s14 = smov 0  }
   0xb   :  { %s3241_s15 = smov 0   ;;  %s3243_s16 = smov 0  }
   0xc LB: > { %s3256_s17 = sadd.s32 4294967295, %s3161_s16   ;;  %s3873_s18 = sadd.s32 4294967294, %s3161_s16   ;;  %s3161_s16 = sphi %s3243_s16, %s3946_s16   ;;  %s3157_s15 = sphi %s3241_s15, %s3950_s15   ;;  %s3153_s14 = sphi %s3239_s14, %s3949_s14   ;;  %s3149_s13 = sphi %s3237_s13, %s3948_s13  }
   0xd   : > { %s3260_s19 = sadd.s32 1, %s3161_s16   ;;  %s118_s20 = sadd.s32 1, %s3157_s15 }
   0xe   : > { %3893 = sst [smem:[#allocation25_spill]] %s3260_s19  ;;  %s115_s21 = ssub.s32 %s3161_s16, %s3260_s19 }
   0xf   : > { %p125_p0 = scmp.ne.s32.totalorder %s3157_s15, %s3153_s14  ;;  %p116_p1 = scmp.eq.s32.totalorder %s115_s21, 0 }
  0x10   : > { %p126_p2 = scmp.eq.s32.totalorder %s3161_s16, 0  ;;  %p131_p3 = scmp.ne.s32.totalorder %s3153_s14, %s3149_s13 }
  0x11   : > { %p3870_p4 = scmp.eq.s32.totalorder %s3256_s17, 0  ;;  %p3871_p7 = scmp.eq.s32.totalorder %s3256_s17, 1 }
  0x12   : > { %s3271_s22 = scalar_select %p116_p1, %s3157_s15, %s118_s20  }
  0x13   : > { %p3273_p5 = por %p126_p2, %p125_p0  ;;  %p3279_p6 = por %p3870_p4, %p131_p3 }
  0x14   : > { %3894 = sst [smem:[#allocation26_spill]] %s3271_s22  ;;  %p271_p8 = scmp.eq.s32.totalorder %s3873_s18, 1 }
  0x15   : > { %s3896_s24 = scalar_select %p3279_p6, 1, 0 }
  0x16   : > { %p2605_p9 = scmp.ge.s32.totalorder %s3161_s16, 1  ;;  %p278_p10 = scmp.lt.s32.totalorder %s3161_s16, 3 }
  0x17   : > { %p3290_p11 = por %p3871_p7, %p125_p0  ;;  %p3294_p12 = por %p271_p8, %p131_p3 }
  0x18   : > { %p3298_p13 = pnand %p2605_p9, %p278_p10  ;;  %s3163_s28 = smov [#allocation2]  }
  0x19   : > { %s3897_s25 = scalar_select %p3290_p11, 1, 0 }
  0x1a   : > { %s3899_s26 = scalar_select %p3294_p12, 1, 0 }
  0x1b   : > { %3898 = sst [smem:[#allocation27_spill]] %s3897_s25  ;;  %p2777_p4 = pneg %p3298_p13 }
  0x1c   : > { %3900 = sst [smem:[#allocation28_spill]] %s3899_s26  ;;  %s291_s29 = sshll.u32 %s3163_s28, 4  ;;  %s292_s29 = int_to_ptr.vmem [resolvable:$true] %s291_s29 }
  0x1d   : > { %s3901_s27 = scalar_select %p3298_p13, 1, 0 }
  0x1e   : > { %p2805_p0 = scmp.lt.s32.totalorder %s3161_s16, 2  ;;  %p3902_p7 = scmp.eq.s32.totalorder %s3256_s17, 0 }
  0x1f   : > { %s343_s12 = sand.u32 1, %s3161_s16   ;;  %s3905_s0 = sld [smem:[#allocation29_spill]] }
  0x20   : > { %p3309_p6 = pnand %p2777_p4, %p3902_p7  ;;  %p3315_p3 = pnand %p2805_p0, %p3273_p5 }
  0x22   : > { %s3903_s30 = scalar_select %p3309_p6, 1, 0 }
  0x23   : > { %s3904_s11 = scalar_select %p3315_p3, 1, 0 }
  0x24   : > { %p3328_p4 = pneg %p3309_p6 }
  0x25   : > { %s2873_s21 = scalar_lea.hbm %s3905_s0, 16 }
  0x26   : > { %p2874_p8 = scmp.ne.s32.totalorder %s3905_s0, %s2873_s21  ;;  %p2880_p9 = scmp.lt.u32.totalorder %s2873_s21, %s3905_s0 }
  0x28   : > { %p2876_p5 = pnand %p3328_p4, %p2874_p8 }
  0x2a   : > { %p2877_p7 = pneg %p2876_p5 }
  0x2c   : > { %p2882_p10 = pnand %p2880_p9, %p2877_p7 }
  0x2e   : > { %2885 = shalt.err (!%p2882_p10)
}
  0x2f   : > { %s2886_s13 = scalar_lea.vmem %s292_s29, 16  ;;  %s2893_s18 = scalar_lea.vmem %s292_s29, 32 }
  0x30   : > { %p2887_p0 = scmp.ne.s32.totalorder %s292_s29, %s2886_s13  ;;  %p2894_p12 = scmp.lt.s32.totalorder %s292_s29, %s292_s29 }
  0x31   : > { %p2895_p11 = scmp.lt.s32.totalorder %s2893_s18, %s2886_s13 }
  0x32   : > { %p2889_p2 = pnand %p2887_p0, %p3328_p4 }
  0x33   : > { %p2896_p13 = por %p2895_p11, %p2894_p12 }
  0x34   : > { %p2890_p1 = pneg %p2889_p2 }
  0x36   : > { %p2897_p3 = pnand %p2896_p13, %p2890_p1 }
  0x38   : > { %2900 = shalt.err (!%p2897_p3)
}
  0x39   : > { %2780 = dma.hbm_to_vmem [thread:$0]  (!%p3309_p6), %s3905_s0, 16, %s292_s29, [#allocation3]  }
  0x3a   : > { %s3883_s19 = sand.u32 1, %s3157_s15   ;;  %s2729_s23 = smul.u32 3072, %s3161_s16 }
  0x3b   : > { %s2743_s21 = smul.u32 384, %s3883_s19  ;;  %s3907_s4 = sld [smem:[#allocation30_spill]] }
  0x3c   : > { %s3164_s10 = smov [#allocation6]   ;;  %s3357_s29 = scalar_lea.sflag [#allocation3], %s343_s12 }
  0x3d   : > { %s347_s20 = scalar_lea.vmem [#allocation8], %s2743_s21  ;;  %s3355_s25 = sshll.u32 %s3164_s10, 4  ;;  %s302_s25 = int_to_ptr.vmem [resolvable:$true] %s3355_s25 }
  0x3e   : > { %s354_s28 = sshll.u32 %s347_s20, 4  ;;  %p3908_p12 = scmp.ne.s32.totalorder %s3904_s11, 0  ;;  %s3353_s28 = int_to_ptr.vmem [resolvable:$true] %s354_s28 }
  0x40   : > { %p3887_p13 = pneg %p3908_p12 }
  0x41   : > { %s3351_s18 = scalar_lea.hbm %s3907_s4, %s2729_s23  ;;  %s2906_s21 = scalar_lea.hbm %s3907_s4, 12288 }
  0x42   : > { %s2901_s19 = scalar_lea.hbm %s3351_s18, 6144  ;;  %p2907_p3 = scmp.lt.u32.totalorder %s3351_s18, %s3907_s4 }
  0x43   : > { %p2902_p11 = scmp.ne.s32.totalorder %s3351_s18, %s2901_s19  ;;  %p2908_p8 = scmp.lt.u32.totalorder %s2906_s21, %s2901_s19 }
  0x44   : > { %p2910_p7 = scmp.lt.u32.totalorder %s2901_s19, %s3351_s18 }
  0x45   : > { %p2904_p1 = pnand %p3887_p13, %p2902_p11  ;;  %p2909_p5 = por %p2908_p8, %p2907_p3 }
  0x47   : > { %p2905_p2 = pneg %p2904_p1  ;;  %p2911_p9 = por %p2910_p7, %p2909_p5 }
  0x49   : > { %p2912_p10 = pnand %p2911_p9, %p2905_p2 }
  0x4b   : > { %2915 = shalt.err (!%p2912_p10)
}
  0x4c   : > { %s2916_s10 = scalar_lea.vmem %s3353_s28, 6144  ;;  %s3165_s12 = smov [#allocation8]  }
  0x4d   : > { %p2917_p0 = scmp.ne.s32.totalorder %s3353_s28, %s2916_s10  ;;  %s2921_s26 = sshll.u32 %s3165_s12, 4  ;;  %s2922_s26 = int_to_ptr.vmem [resolvable:$false] %s2921_s26 }
  0x4e   : > { %s2923_s23 = scalar_lea.vmem %s2922_s26, 12288  ;;  %p2924_p6 = scmp.lt.s32.totalorder %s3353_s28, %s2922_s26 }
  0x4f   : > { %p2919_p11 = pnand %p2917_p0, %p3887_p13  ;;  %p2925_p3 = scmp.lt.s32.totalorder %s2923_s23, %s2916_s10 }
  0x51   : > { %p2920_p1 = pneg %p2919_p11  ;;  %p2926_p8 = por %p2925_p3, %p2924_p6 }
  0x53   : > { %p2927_p5 = pnand %p2926_p8, %p2920_p1 }
  0x55   : > { %2930 = shalt.err (!%p2927_p5)
}
  0x56   : > { %s3166_s19 = smov 6144   ;;  %s3167_s21 = smov 3072  }
  0x57   : > { %s3168_s13 = smov 192   ;;  %s2931_s26 = scalar_lea.hbm %s3860_s1, 768 }
  0x58   : > { %2793 = dma.hbm_to_vmem [thread:$0]  (!%p3908_p12), %s3351_s18, 6144, %s3353_s28, %s3357_s29, %s3166_s19, %s3167_s21, %s3168_s13  }
  0x59   : > { %p2932_p6 = scmp.ne.s32.totalorder %s3860_s1, %s2931_s26  ;;  %p2938_p9 = scmp.lt.u32.totalorder %s2931_s26, %s3860_s1 }
  0x5b   : > { %p2934_p2 = pnand %p2932_p6, %p3328_p4 }
  0x5d   : > { %p2935_p7 = pneg %p2934_p2 }
  0x5f   : > { %p2940_p10 = pnand %p2938_p9, %p2935_p7 }
  0x61   : > { %2943 = shalt.err (!%p2940_p10)
}
  0x62   : > { %s2944_s9 = scalar_lea.vmem %s302_s25, 768  ;;  %p2952_p3 = scmp.lt.s32.totalorder %s302_s25, %s302_s25 }
  0x63   : > { %p2945_p0 = scmp.ne.s32.totalorder %s302_s25, %s2944_s9  ;;  %p2953_p8 = scmp.lt.s32.totalorder %s2944_s9, %s2944_s9 }
  0x65   : > { %p2947_p11 = pnand %p2945_p0, %p3328_p4  ;;  %p2954_p5 = por %p2953_p8, %p2952_p3 }
  0x67   : > { %p2948_p1 = pneg %p2947_p11 }
  0x69   : > { %p2955_p13 = pnand %p2954_p5, %p2948_p1 }
  0x6b   : > { %2958 = shalt.err (!%p2955_p13)
}
  0x6c   : > { %s3169_s18 = smov 12   ;;  %p3909_p6 = scmp.ne.s32.totalorder %s3903_s30, 0 }
  0x6d   : > { %s321_s21 = sshll.u32 %s3865_s6, 4  ;;  %s332_s9 = sshll.u32 %s3866_s7, 4  ;;  %s322_s21 = int_to_ptr.vmem [resolvable:$true] %s321_s21  ;;  %s333_s9 = int_to_ptr.vmem [resolvable:$true] %s332_s9 }
  0x6e   : > { %2783 = dma.hbm_to_vmem [thread:$0]  (!%p3909_p6), %s3860_s1, 768, %s302_s25, [#allocation7], %s3168_s13, %s3168_s13, %s3169_s18  }
  0x6f   : > { %s2959_s26 = scalar_lea.vmem %s322_s21, 16  ;;  %p2967_p9 = scmp.lt.s32.totalorder %s322_s21, %s322_s21 }
  0x70   : > { %p2960_p2 = scmp.ne.s32.totalorder %s322_s21, %s2959_s26  ;;  %p2968_p10 = scmp.lt.s32.totalorder %s2959_s26, %s2959_s26 }
  0x72   : > { %p2962_p13 = pnand %p2960_p2, %p3328_p4  ;;  %p2969_p0 = por %p2968_p10, %p2967_p9 }
  0x74   : > { %p2963_p7 = pneg %p2962_p13 }
  0x76   : > { %p2970_p11 = pnand %p2969_p0, %p2963_p7 }
  0x78   : > { %2973 = shalt.err (!%p2970_p11)
}
  0x79   : > { %s3170_s25 = smov [#allocation10]   ;;  %s2974_s13 = scalar_lea.vmem %s333_s9, 16 }
  0x7a   : > { %2786 = dma.vmem_to_smem (!%p3909_p6), %s322_s21, 16, %s3170_s25, [#allocation5]  }
  0x7b   : > { %p2975_p1 = scmp.ne.s32.totalorder %s333_s9, %s2974_s13  ;;  %p2982_p5 = scmp.lt.s32.totalorder %s333_s9, %s333_s9 }
  0x7c   : > { %p2983_p12 = scmp.lt.s32.totalorder %s2974_s13, %s2974_s13 }
  0x7d   : > { %p2977_p3 = pnand %p2975_p1, %p3328_p4 }
  0x7e   : > { %p2984_p2 = por %p2983_p12, %p2982_p5 }
  0x7f   : > { %p2978_p8 = pneg %p2977_p3 }
  0x81   : > { %p2985_p13 = pnand %p2984_p2, %p2978_p8 }
  0x83   : > { %2988 = shalt.err (!%p2985_p13)
}
  0x84   : > { %s3171_s10 = smov [#allocation11]   ;;  %s3910_s23 = sand.u32 1, %s3157_s15  }
  0x85   : > { %2789 = dma.vmem_to_smem (!%p3909_p6), %s333_s9, 16, %s3171_s10, [#allocation12]  }
  0x86   : > { %s2744_s18 = smul.u32 48, %s3910_s23  ;;  %p3911_p12 = scmp.ne.s32.totalorder %s3904_s11, 0 }
  0x87   : > { %s2730_s28 = smul.u32 768, %s3161_s16  ;;  %s2994_s9 = scalar_lea.hbm %s3864_s5, 1536 }
  0x88   : > { %s368_s4 = scalar_lea.vmem [#allocation9], %s2744_s18  ;;  %p3912_p7 = pneg %p3911_p12 }
  0x89   : > { %s3424_s22 = scalar_lea.hbm %s3864_s5, %s2730_s28  ;;  %s376_s21 = sshll.u32 %s368_s4, 4  ;;  %s377_s21 = int_to_ptr.vmem [resolvable:$true] %s376_s21 }
  0x8a   : > { %s2989_s30 = scalar_lea.hbm %s3424_s22, 768  ;;  %p2995_p10 = scmp.lt.u32.totalorder %s3424_s22, %s3864_s5 }
  0x8b   : > { %p2990_p4 = scmp.ne.s32.totalorder %s3424_s22, %s2989_s30  ;;  %p2996_p0 = scmp.lt.u32.totalorder %s2994_s9, %s2989_s30 }
  0x8c   : > { %p2998_p1 = scmp.lt.u32.totalorder %s2989_s30, %s3424_s22 }
  0x8d   : > { %p2992_p6 = pnand %p2990_p4, %p3912_p7  ;;  %p2997_p11 = por %p2996_p0, %p2995_p10 }
  0x8f   : > { %p2993_p9 = pneg %p2992_p6  ;;  %p2999_p3 = por %p2998_p1, %p2997_p11 }
  0x91   : > { %p3000_p8 = pnand %p2999_p3, %p2993_p9 }
  0x93   : > { %3003 = shalt.err (!%p3000_p8)
}
  0x94   : > { %s3004_s13 = scalar_lea.vmem %s377_s21, 768  ;;  %p3913_p2 = pmov %p3912_p7 }
  0x95   : > { %p3005_p5 = scmp.ne.s32.totalorder %s377_s21, %s3004_s13  ;;  %s3172_s10 = smov [#allocation9]  }
  0x96   : > { %s3009_s23 = sshll.u32 %s3172_s10, 4  ;;  %s3010_s23 = int_to_ptr.vmem [resolvable:$false] %s3009_s23 }
  0x97   : > { %p3007_p13 = pnand %p3005_p5, %p3913_p2  ;;  %s3011_s18 = scalar_lea.vmem %s3010_s23, 1536 }
  0x98   : > { %p3012_p7 = scmp.lt.s32.totalorder %s377_s21, %s3010_s23  ;;  %p3013_p6 = scmp.lt.s32.totalorder %s3011_s18, %s3004_s13 }
  0x99   : > { %p3008_p4 = pneg %p3007_p13 }
  0x9a   : > { %p3014_p0 = por %p3013_p6, %p3012_p7 }
  0x9c   : > { %p3015_p10 = pnand %p3014_p0, %p3008_p4 }
  0x9e   : > { %3018 = shalt.err (!%p3015_p10)
}
  0x9f   : > { %2796 = dma.hbm_to_vmem [thread:$0]  (!%p3911_p12), %s3424_s22, 768, %s377_s21, %s3357_s29  }
  0xa0   : > { %p3914_p9 = scmp.ne.s32.totalorder %s3901_s27, 0 }
  0xa1   : > { %p3915_p11 = scmp.eq.s32.totalorder (!%p3914_p9), %s3256_s17, 0 }
  0xa2   : > { %385 = sbr.rel (%p3914_p9) target bundleno = 838 (0x346), region = 52 }
  0xa9   : > { %3116 = dma.done.wait (%p3915_p11), [#allocation3], 16   ;;  %p3916_p1 = pmov %p3915_p11 }
  0xab   : > { %3118 = vsyncadd (%p3916_p1), [#allocation3], 4294967280  ;;  %p3917_p3 = pmov %p3916_p1 }
  0xac   : > { %p3918_p8 = pmov %p3916_p1 }
  0xad   : > { %3120 = dma.done.wait (%p3917_p3), [#allocation7], 768  }
  0xae   : > { %3122 = vsyncadd (%p3918_p8), [#allocation7], 4294966528  ;;  %s395_s11 = sand.u32 1, %s3256_s17   ;;  %s397_s29 = sand.u32 1, %s3153_s14  }
  0xaf   : > { %s2745_s27 = smul.u32 384, %s397_s29  ;;  %s396_s28 = scalar_lea.sflag [#allocation3], %s395_s11 }
  0xb0   : > { %p3919_p12 = scmp.ne.s32.totalorder %s3896_s24, 0 }
  0xb1   : > { %s3460_s19 = scalar_lea.vmem [#allocation8], %s2745_s27 }
  0xb2   : > { %3124 = dma.done.wait (%p3919_p12), %s396_s28, 6912  }
  0xb3   : > { %3126 = vsyncadd (%p3919_p12), %s396_s28, 4294960384  ;;  %s3466_s0 = smul.u32 48, %s397_s29  ;;  %p3920_p5 = pmov %p3916_p1 }
  0xb5   : > { %s3469_s22 = scalar_lea.vmem [#allocation9], %s3466_s0 }
  0xb6   : > { %3128 = dma.done.wait (%p3920_p5), [#allocation5], 16   ;;  %p3921_p2 = pmov %p3916_p1 }
  0xb7   : > { %p3922_p13 = pmov %p3916_p1 }
  0xb8   : > { %3130 = vsyncadd (%p3921_p2), [#allocation5], 4294967280 }
  0xb9   : > { %3132 = dma.done.wait (%p3922_p13), [#allocation12], 16   ;;  %p3923_p4 = pmov %p3916_p1 }
  0xbb   : > { %3134 = vsyncadd (%p3923_p4), [#allocation12], 4294967280 }
  0xbc   : > { %421 = sfence }
  0xbd   : > { %v482_v0 = vld [vmem:[%s3460_s19] sm:$0xff]  ;;  %v483_v2 = vld [vmem:[%s3460_s19 + $0x8] sm:$0xff]  ;;  %v3173_v6 = vmov 0   ;;  %v484_v7 = vld [vmem:[%s3460_s19 + $0x10] sm:$0xff]  ;;  %vm770_vm0 = vcmask 130048   ;;  %s3619_s21 = scalar_lea.vmem [#allocation16], %s3466_s0 }
  0xbe   : > { %v506_v1 = vld [vmem:[%s3460_s19 + $0xc0] sm:$0xff]  ;;  %v507_v4 = vld [vmem:[%s3460_s19 + $0xc8] sm:$0xff]  ;;  %806 = vmatprep.mubr.bf16.mxu0 %v3173_v6  ;;  %847 = vmatprep.mubr.bf16.mxu1 %v3173_v6  ;;  %v508_v10 = vld [vmem:[%s3460_s19 + $0xd0] sm:$0xff]  ;;  %p3924_p7 = scmp.ne.s32.totalorder %s3256_s17, 0 }
  0xbf   : > { %v2619_v3 = vcombine.high %v482_v0, %v506_v1  ;;  %v2618_v5 = vcombine.low %v482_v0, %v506_v1  ;;  %v2621_v8 = vcombine.high %v483_v2, %v507_v4  ;;  %v2620_v9 = vcombine.low %v483_v2, %v507_v4  ;;  %v485_v11 = vld [vmem:[%s3460_s19 + $0x18] sm:$0xff]  ;;  %v486_v15 = vld [vmem:[%s3460_s19 + $0x20] sm:$0xff]  ;;  %v487_v19 = vld [vmem:[%s3460_s19 + $0x28] sm:$0xff]  ;;  %s3662_s30 = sld [smem:[#allocation10]] (!%p3924_p7)  ;;  %s3665_s20 = sld [smem:[#allocation10 + $0x3]] (!%p3924_p7) }
  0xc0   : > { %v509_v12 = vld [vmem:[%s3460_s19 + $0xd8] sm:$0xff]  ;;  %v2623_v13 = vcombine.high %v484_v7, %v508_v10  ;;  %v510_v16 = vld [vmem:[%s3460_s19 + $0xe0] sm:$0xff]  ;;  %v2622_v18 = vcombine.low %v484_v7, %v508_v10  ;;  %v511_v20 = vld [vmem:[%s3460_s19 + $0xe8] sm:$0xff]  ;;  %vm3178_vm1 = vmmov (!%p3924_p7), 0   ;;  %vm2194_vm2 = vcmask (!%p3924_p7), 261120   ;;  %s3667_s12 = sld [smem:[#allocation10 + $0x6]] (!%p3924_p7) }
  0xc1   : > { %774 = vmatprep.subr.bf16.mxu0 %v2619_v3  ;;  %v2625_v14 = vcombine.high %v485_v11, %v509_v12  ;;  %815 = vmatprep.subr.bf16.mxu1 %v2621_v8  ;;  %v3494_v17 = vld [vmem:[%s3862_s3] sm:$0x1]  ;;  %v2624_v21 = vcombine.low %v485_v11, %v509_v12  ;;  %v2627_v22 = vcombine.high %v486_v15, %v510_v16  ;;  %v488_v24 = vld [vmem:[%s3460_s19 + $0x30] sm:$0xff]  ;;  %v489_v27 = vld [vmem:[%s3460_s19 + $0x38] sm:$0xff]  ;;  %s3669_s9 = sld [smem:[#allocation10 + $0x1]] (!%p3924_p7)  ;;  %s3671_s26 = sld [smem:[#allocation10 + $0x4]] (!%p3924_p7) }
  0xc2   : > { %775 = vmatpush1.bf16.msra.mxu0 %v2618_v5  ;;  %816 = vmatpush1.bf16.msra.mxu1 %v2620_v9  ;;  %v2629_v23 = vcombine.high %v487_v19, %v511_v20  ;;  %v512_v25 = vld [vmem:[%s3460_s19 + $0xf0] sm:$0xff]  ;;  %v2626_v26 = vcombine.low %v486_v15, %v510_v16  ;;  %v513_v28 = vld [vmem:[%s3460_s19 + $0xf8] sm:$0xff]  ;;  %v2628_v29 = vcombine.low %v487_v19, %v511_v20  ;;  %v490_v32 = vld [vmem:[%s3460_s19 + $0x40] sm:$0xff]  ;;  %s3674_s25 = sld [smem:[#allocation10 + $0x2]] (!%p3924_p7)  ;;  %s3676_s13 = sld [smem:[#allocation10 + $0x7]] (!%p3924_p7) }
  0xc3   : > { %856 = vmatprep.subr.bf16.mxu0 %v2623_v13  ;;  %897 = vmatprep.subr.bf16.mxu1 %v2625_v14  ;;  %v2631_v30 = vcombine.high %v488_v24, %v512_v25  ;;  %v2633_v31 = vcombine.high %v489_v27, %v513_v28  ;;  %v514_v33 = vld [vmem:[%s3460_s19 + $0x100] sm:$0xff]  ;;  %v2630_v34 = vcombine.low %v488_v24, %v512_v25  ;;  %v491_v35 = vld [vmem:[%s3460_s19 + $0x48] sm:$0xff]  ;;  %v492_v40 = vld [vmem:[%s3460_s19 + $0x50] sm:$0xff]  ;;  %s3678_s10 = sld [smem:[#allocation10 + $0x5]] (!%p3924_p7)  ;;  %s3680_s23 = sld [smem:[#allocation10 + $0x8]] (!%p3924_p7) }
  0xc4   : > { %v515_v36 = vld [vmem:[%s3460_s19 + $0x108] sm:$0xff]  ;;  %v2632_v37 = vcombine.low %v489_v27, %v513_v28  ;;  %v2635_v38 = vcombine.high %v490_v32, %v514_v33  ;;  %v516_v41 = vld [vmem:[%s3460_s19 + $0x110] sm:$0xff]  ;;  %v2634_v42 = vcombine.low %v490_v32, %v514_v33  ;;  %v493_v43 = vld [vmem:[%s3460_s19 + $0x58] sm:$0xff]  ;;  %s3685_s27 = sld [smem:[#allocation11 + $0xc]] (!%p3924_p7)  ;;  %s3687_s28 = sld [smem:[#allocation11 + $0xd]] (!%p3924_p7) }
  0xc5   : > { %2666 = vmatmul.mubr.msk.bf16.vlgmr.msra.gmra.mrb[0].mxu0 %vm770_vm0, %v3494_v17  ;;  %2667 = vmatmul.mubr.msk.bf16.vlgmr.msra.gmra.mrb[0].mxu1 %vm770_vm0, %v3494_v17  ;;  %v2637_v39 = vcombine.high %v491_v35, %v515_v36  ;;  %v517_v44 = vld [vmem:[%s3460_s19 + $0x118] sm:$0xff]  ;;  %v2636_v45 = vcombine.low %v491_v35, %v515_v36  ;;  %v2639_v46 = vcombine.high %v492_v40, %v516_v41  ;;  %v494_v48 = vld [vmem:[%s3460_s19 + $0x60] sm:$0xff]  ;;  %v495_v51 = vld [vmem:[%s3460_s19 + $0x68] sm:$0xff]  ;;  %v3174_v36 = vmov 1983009808   ;;  %s3704_s0 = sld [smem:[#allocation11 + $0x1]] (!%p3924_p7) }
  0xc6   : > { %857 = vmatpush1.bf16.msra.mxu0 %v2622_v18  ;;  %898 = vmatpush1.bf16.msra.mxu1 %v2624_v21  ;;  %v2641_v47 = vcombine.high %v493_v43, %v517_v44  ;;  %v518_v49 = vld [vmem:[%s3460_s19 + $0x120] sm:$0xff]  ;;  %v2638_v50 = vcombine.low %v492_v40, %v516_v41  ;;  %v519_v52 = vld [vmem:[%s3460_s19 + $0x128] sm:$0xff]  ;;  %v2640_v53 = vcombine.low %v493_v43, %v517_v44  ;;  %v496_v56 = vld [vmem:[%s3460_s19 + $0x70] sm:$0xff]  ;;  %s3711_s24 = sld [smem:[#allocation11 + $0x9]] (!%p3924_p7)  ;;  %s3715_s4 = sld [smem:[#allocation11]] (!%p3924_p7) }
  0xc7   : > { %888 = vmatprep.mubr.bf16.mxu0 %v3173_v6  ;;  %929 = vmatprep.mubr.bf16.mxu1 %v3173_v6  ;;  %v2643_v54 = vcombine.high %v494_v48, %v518_v49  ;;  %v2645_v55 = vcombine.high %v495_v51, %v519_v52  ;;  %v520_v57 = vld [vmem:[%s3460_s19 + $0x130] sm:$0xff]  ;;  %v2642_v58 = vcombine.low %v494_v48, %v518_v49  ;;  %v497_v59 = vld [vmem:[%s3460_s19 + $0x78] sm:$0xff]  ;;  %v498_v0 = vld [vmem:[%s3460_s19 + $0x80] sm:$0xff] }
  0xc8   : > { %938 = vmatprep.subr.bf16.mxu0 %v2627_v22  ;;  %979 = vmatprep.subr.bf16.mxu1 %v2629_v23  ;;  %v521_v60 = vld [vmem:[%s3460_s19 + $0x138] sm:$0xff]  ;;  %v2644_v61 = vcombine.low %v495_v51, %v519_v52  ;;  %v2647_v62 = vcombine.high %v496_v56, %v520_v57  ;;  %v522_v1 = vld [vmem:[%s3460_s19 + $0x140] sm:$0xff]  ;;  %v2646_v2 = vcombine.low %v496_v56, %v520_v57  ;;  %v499_v3 = vld [vmem:[%s3460_s19 + $0x88] sm:$0xff] }
  0xc9   : > { %v2649_v63 = vcombine.high %v497_v59, %v521_v60  ;;  %v523_v4 = vld [vmem:[%s3460_s19 + $0x148] sm:$0xff]  ;;  %v2648_v5 = vcombine.low %v497_v59, %v521_v60  ;;  %v2651_v7 = vcombine.high %v498_v0, %v522_v1  ;;  %v500_v9 = vld [vmem:[%s3460_s19 + $0x90] sm:$0xff]  ;;  %v2650_v11 = vcombine.low %v498_v0, %v522_v1  ;;  %v501_v12 = vld [vmem:[%s3460_s19 + $0x98] sm:$0xff] }
  0xca   : > { %v2653_v8 = vcombine.high %v499_v3, %v523_v4  ;;  %v524_v10 = vld [vmem:[%s3460_s19 + $0x150] sm:$0xff]  ;;  %v525_v13 = vld [vmem:[%s3460_s19 + $0x158] sm:$0xff]  ;;  %v2652_v14 = vcombine.low %v499_v3, %v523_v4  ;;  %v502_v18 = vld [vmem:[%s3460_s19 + $0xa0] sm:$0xff] }
  0xcb   : > { %v2655_v15 = vcombine.high %v500_v9, %v524_v10  ;;  %v2657_v16 = vcombine.high %v501_v12, %v525_v13  ;;  %v526_v19 = vld [vmem:[%s3460_s19 + $0x160] sm:$0xff]  ;;  %v2654_v20 = vcombine.low %v500_v9, %v524_v10  ;;  %v503_v21 = vld [vmem:[%s3460_s19 + $0xa8] sm:$0xff]  ;;  %v2656_v23 = vcombine.low %v501_v12, %v525_v13  ;;  %v528_v27 = vld [vmem:[%s3460_s19 + $0x170] sm:$0xff] }
  0xcc   : > { %v527_v22 = vld [vmem:[%s3460_s19 + $0x168] sm:$0xff]  ;;  %v2659_v24 = vcombine.high %v502_v18, %v526_v19  ;;  %v2658_v28 = vcombine.low %v502_v18, %v526_v19 }
  0xcd   : > { %2668 = vmatmul.mubr.msk.bf16.vlgmr.msra.gmra.mrb[4].mxu0 %vm770_vm0, %v3494_v17  ;;  %2669 = vmatmul.mubr.msk.bf16.vlgmr.msra.gmra.mrb[4].mxu1 %vm770_vm0, %v3494_v17  ;;  %v2661_v25 = vcombine.high %v503_v21, %v527_v22 }
  0xce   : > { %939 = vmatpush1.bf16.msra.mxu0 %v2626_v26  ;;  %980 = vmatpush1.bf16.msra.mxu1 %v2628_v29  ;;  %v504_v26 = vld [vmem:[%s3460_s19 + $0xb0] sm:$0xff]  ;;  %v505_v29 = vld [vmem:[%s3460_s19 + $0xb8] sm:$0xff] }
  0xcf   : > { %970 = vmatprep.mubr.bf16.mxu0 %v3173_v6  ;;  %1011 = vmatprep.mubr.bf16.mxu1 %v3173_v6  ;;  %v2663_v32 = vcombine.high %v504_v26, %v528_v27 }
  0xd0   : > { %1020 = vmatprep.subr.bf16.mxu0 %v2631_v30  ;;  %1061 = vmatprep.subr.bf16.mxu1 %v2633_v31  ;;  %v529_v30 = vld [vmem:[%s3460_s19 + $0x178] sm:$0xff]  ;;  %v2660_v31 = vcombine.low %v503_v21, %v527_v22  ;;  %s3692_s19 = sld [smem:[#allocation11 + $0xe]] (!%p3924_p7) }
  0xd1   : > { %v2665_v33 = vcombine.high %v505_v29, %v529_v30  ;;  %v2664_v35 = vcombine.low %v505_v29, %v529_v30  ;;  %v464_v29 = vld [vmem:[%s3469_s22 + $0x8] sm:$0xff] }
  0xd5   : > { %2670 = vmatmul.mubr.msk.bf16.vlgmr.msra.gmra.mrb[8].mxu0 %vm770_vm0, %v3494_v17  ;;  %2671 = vmatmul.mubr.msk.bf16.vlgmr.msra.gmra.mrb[8].mxu1 %vm770_vm0, %v3494_v17 }
  0xd6   : > { %1021 = vmatpush1.bf16.msra.mxu0 %v2630_v34  ;;  %1062 = vmatpush1.bf16.msra.mxu1 %v2632_v37  ;;  %v2662_v34 = vcombine.low %v504_v26, %v528_v27  ;;  %v1809_v37 = vunpack.c.l.s4 %v3174_v36  ;;  %v471_v36 = vunpack.c.l.bf16 %v464_v29 }
  0xd7   : > { %1052 = vmatprep.mubr.bf16.mxu0 %v3173_v6  ;;  %1093 = vmatprep.mubr.bf16.mxu1 %v3173_v6 }
  0xd8   : > { %1102 = vmatprep.subr.bf16.mxu0 %v2635_v38  ;;  %1143 = vmatprep.subr.bf16.mxu1 %v2637_v39  ;;  %v1811_v38 = vlaneseq  ;;  %v1810_v39 = vunpack.c.0.s8 %v1809_v37 }
  0xda   : > { %v1812_v40 = vshrl.u32 %v1811_v38, 7  ;;  %vm3729_vm3 = vcmp.lt.s32.totalorder (!%p3924_p7), %v1811_v38, 128 }
  0xdd   : > { %2672 = vmatmul.mubr.msk.bf16.vlgmr.msra.gmra.mrb[12].mxu0 %vm770_vm0, %v3494_v17  ;;  %2673 = vmatmul.mubr.msk.bf16.vlgmr.msra.gmra.mrb[12].mxu1 %vm770_vm0, %v3494_v17 }
  0xde   : > { %1103 = vmatpush1.bf16.msra.mxu0 %v2634_v42  ;;  %1144 = vmatpush1.bf16.msra.mxu1 %v2636_v45  ;;  %v3605_v42 = vsub.s32 %v1810_v39, %v1812_v40 }
  0xdf   : > { %1134 = vmatprep.mubr.bf16.mxu0 %v3173_v6  ;;  %1175 = vmatprep.mubr.bf16.mxu1 %v3173_v6 }
  0xe0   : > { %1184 = vmatprep.subr.bf16.mxu0 %v2639_v46  ;;  %1225 = vmatprep.subr.bf16.mxu1 %v2641_v47 }
  0xe5   : > { %2674 = vmatmul.mubr.msk.bf16.vlgmr.msra.gmra.mrb[16].mxu0 %vm770_vm0, %v3494_v17  ;;  %2675 = vmatmul.mubr.msk.bf16.vlgmr.msra.gmra.mrb[16].mxu1 %vm770_vm0, %v3494_v17 }
  0xe6   : > { %1185 = vmatpush1.bf16.msra.mxu0 %v2638_v50  ;;  %1226 = vmatpush1.bf16.msra.mxu1 %v2640_v53  ;;  %v3175_v53 = vmov 1966171168  }
  0xe7   : > { %1216 = vmatprep.mubr.bf16.mxu0 %v3173_v6  ;;  %1257 = vmatprep.mubr.bf16.mxu1 %v3173_v6 }
  0xe8   : > { %1266 = vmatprep.subr.bf16.mxu0 %v2643_v54  ;;  %1307 = vmatprep.subr.bf16.mxu1 %v2645_v55  ;;  %v2047_v54 = vunpack.c.l.s4 %v3175_v53  ;;  %v463_v55 = vld [vmem:[%s3469_s22] sm:$0xff] }
  0xed   : > { %2676 = vmatmul.mubr.msk.bf16.vlgmr.msra.gmra.mrb[20].mxu0 %vm770_vm0, %v3494_v17  ;;  %2677 = vmatmul.mubr.msk.bf16.vlgmr.msra.gmra.mrb[20].mxu1 %vm770_vm0, %v3494_v17 }
  0xee   : > { %1267 = vmatpush1.bf16.msra.mxu0 %v2642_v58  ;;  %1308 = vmatpush1.bf16.msra.mxu1 %v2644_v61 }
  0xef   : > { %1298 = vmatprep.mubr.bf16.mxu0 %v3173_v6  ;;  %1339 = vmatprep.mubr.bf16.mxu1 %v3173_v6 }
  0xf0   : > { %1348 = vmatprep.subr.bf16.mxu0 %v2647_v62  ;;  %1389 = vmatprep.subr.bf16.mxu1 %v2649_v63  ;;  %v469_v62 = vunpack.c.l.bf16 %v463_v55  ;;  %v2048_v63 = vunpack.c.0.s8 %v2047_v54 }
  0xf2   : > { %v3612_v9 = vsub.s32 %v2048_v63, %v1812_v40  ;;  %v465_v63 = vld [vmem:[%s3469_s22 + $0x10] sm:$0xff] }
  0xf5   : > { %2678 = vmatmul.mubr.msk.bf16.vlgmr.msra.gmra.mrb[24].mxu0 %vm770_vm0, %v3494_v17  ;;  %2679 = vmatmul.mubr.msk.bf16.vlgmr.msra.gmra.mrb[24].mxu1 %vm770_vm0, %v3494_v17 }
  0xf6   : > { %1349 = vmatpush1.bf16.msra.mxu0 %v2646_v2  ;;  %1390 = vmatpush1.bf16.msra.mxu1 %v2648_v5  ;;  %v470_v5 = vunpack.c.h.bf16 %v463_v55 }
  0xf7   : > { %1380 = vmatprep.mubr.bf16.mxu0 %v3173_v6  ;;  %1421 = vmatprep.mubr.bf16.mxu1 %v3173_v6 }
  0xf8   : > { %1430 = vmatprep.subr.bf16.mxu0 %v2651_v7  ;;  %1471 = vmatprep.subr.bf16.mxu1 %v2653_v8 }
  0xfd   : > { %2680 = vmatmul.mubr.msk.bf16.vlgmr.msra.gmra.mrb[28].mxu0 %vm770_vm0, %v3494_v17  ;;  %2681 = vmatmul.mubr.msk.bf16.vlgmr.msra.gmra.mrb[28].mxu1 %vm770_vm0, %v3494_v17 }
  0xfe   : > { %1431 = vmatpush1.bf16.msra.mxu0 %v2650_v11  ;;  %1472 = vmatpush1.bf16.msra.mxu1 %v2652_v14 }
  0xff   : > { %1462 = vmatprep.mubr.bf16.mxu0 %v3173_v6  ;;  %1503 = vmatprep.mubr.bf16.mxu1 %v3173_v6 }
 0x100   : > { %1512 = vmatprep.subr.bf16.mxu0 %v2655_v15  ;;  %1553 = vmatprep.subr.bf16.mxu1 %v2657_v16 }
 0x105   : > { %2682 = vmatmul.mubr.msk.bf16.vlgmr.msra.gmra.mrb[32].mxu0 %vm770_vm0, %v3494_v17  ;;  %2683 = vmatmul.mubr.msk.bf16.vlgmr.msra.gmra.mrb[32].mxu1 %vm770_vm0, %v3494_v17 }
 0x106   : > { %1513 = vmatpush1.bf16.msra.mxu0 %v2654_v20  ;;  %1554 = vmatpush1.bf16.msra.mxu1 %v2656_v23 }
 0x107   : > { %1544 = vmatprep.mubr.bf16.mxu0 %v3173_v6  ;;  %1585 = vmatprep.mubr.bf16.mxu1 %v3173_v6 }
 0x108   : > { %1594 = vmatprep.subr.bf16.mxu0 %v2659_v24  ;;  %1635 = vmatprep.subr.bf16.mxu1 %v2661_v25 }
 0x10d   : > { %2684 = vmatmul.mubr.msk.bf16.vlgmr.msra.gmra.mrb[36].mxu0 %vm770_vm0, %v3494_v17  ;;  %2685 = vmatmul.mubr.msk.bf16.vlgmr.msra.gmra.mrb[36].mxu1 %vm770_vm0, %v3494_v17 }
 0x10e   : > { %1595 = vmatpush1.bf16.msra.mxu0 %v2658_v28  ;;  %1636 = vmatpush1.bf16.msra.mxu1 %v2660_v31 }
 0x10f   : > { %1626 = vmatprep.mubr.bf16.mxu0 %v3173_v6  ;;  %1667 = vmatprep.mubr.bf16.mxu1 %v3173_v6 }
 0x110   : > { %1676 = vmatprep.subr.bf16.mxu0 %v2663_v32  ;;  %1717 = vmatprep.subr.bf16.mxu1 %v2665_v33 }
 0x115   : > { %2686 = vmatmul.mubr.msk.bf16.vlgmr.msra.gmra.mrb[40].mxu0 %vm770_vm0, %v3494_v17  ;;  %2687 = vmatmul.mubr.msk.bf16.vlgmr.msra.gmra.mrb[40].mxu1 %vm770_vm0, %v3494_v17 }
 0x116   : > { %1677 = vmatpush1.bf16.msra.mxu0 %v2662_v34  ;;  %1718 = vmatpush1.bf16.msra.mxu1 %v2664_v35 }
 0x117   : > { %1708 = vmatprep.mubr.bf16.mxu0 %v3173_v6  ;;  %1749 = vmatprep.mubr.bf16.mxu1 %v3173_v6 }
 0x11d   : > { %2688 = vmatmul.mubr.msk.bf16.vlgmr.msra.gmra.mrb[44].mxu0 %vm770_vm0, %v3494_v17  ;;  %2689 = vmatmul.mubr.msk.bf16.vlgmr.msra.gmra.mrb[44].mxu1 %vm770_vm0, %v3494_v17 }
 0x198   : > { %v808_v41 = vpop.f32.mrb[0].mxu0  ;;  %v849_v43 = vpop.f32.mrb[0].mxu1 }
 0x199   : > { %v810_v44 = vpop.f32.mrb[1].mxu0  ;;  %v851_v6 = vpop.f32.mrb[1].mxu1 }
 0x19a   : > { %v1806_v45 = vcombine.low %v808_v41, %v810_v44  ;;  %v812_v46 = vpop.f32.mrb[2].mxu0  ;;  %v1807_v47 = vcombine.low %v849_v43, %v851_v6  ;;  %v853_v48 = vpop.f32.mrb[2].mxu1  ;;  %v472_v44 = vunpack.c.h.bf16 %v464_v29 }
 0x19b   : > { %v813_v49 = vpop.f32.mrb[3].mxu0  ;;  %v854_v50 = vpop.f32.mrb[3].mxu1 }
 0x19c   : > { %v1814_v17 = vrot.slane %v1806_v45, %v3605_v42  ;;  %v1821_v51 = vrot.slane %v1807_v47, %v3605_v42 }
 0x19e   : > { %v1822_v52 = vcombine.low %v1814_v17, %v1821_v51 }
 0x1a0   : > { %v890_v56 = vpop.f32.mrb[4].mxu0  ;;  %v931_v57 = vpop.f32.mrb[4].mxu1  ;;  %v2022_v8 = vadd.f32 %v1822_v52, %v469_v62 }
 0x1a1   : > { %v892_v58 = vpop.f32.mrb[5].mxu0  ;;  %v933_v60 = vpop.f32.mrb[5].mxu1 }
 0x1a2   : > { %v1823_v59 = vcombine.low %v890_v56, %v892_v58  ;;  %v894_v61 = vpop.f32.mrb[6].mxu0  ;;  %v1824_v0 = vcombine.low %v931_v57, %v933_v60  ;;  %v935_v1 = vpop.f32.mrb[6].mxu1  ;;  %v2052_v19 = vrot.slane %v2022_v8, %v3612_v9 }
 0x1a3   : > { %v895_v2 = vpop.f32.mrb[7].mxu0  ;;  %v936_v4 = vpop.f32.mrb[7].mxu1 }
 0x1a4   : > { %v1831_v3 = vrot.slane %v1823_v59, %v3605_v42  ;;  %v1838_v7 = vrot.slane %v1824_v0, %v3605_v42 }
 0x1a6   : > { %v1839_v10 = vcombine.low %v1831_v3, %v1838_v7  ;;  %v473_v7 = vunpack.c.l.bf16 %v465_v63 }
 0x1a8   : > { %v972_v11 = vpop.f32.mrb[8].mxu0  ;;  %v2023_v12 = vadd.f32 %v1839_v10, %v470_v5  ;;  %v1013_v13 = vpop.f32.mrb[8].mxu1 }
 0x1a9   : > { %v974_v14 = vpop.f32.mrb[9].mxu0  ;;  %v1015_v16 = vpop.f32.mrb[9].mxu1 }
 0x1aa   : > { %v1840_v15 = vcombine.low %v972_v11, %v974_v14  ;;  %v976_v18 = vpop.f32.mrb[10].mxu0  ;;  %v2059_v20 = vrot.slane %v2023_v12, %v3612_v9  ;;  %v1841_v21 = vcombine.low %v1013_v13, %v1015_v16  ;;  %v1017_v22 = vpop.f32.mrb[10].mxu1  ;;  %v474_v14 = vunpack.c.h.bf16 %v465_v63 }
 0x1ab   : > { %v977_v23 = vpop.f32.mrb[11].mxu0  ;;  %v1018_v25 = vpop.f32.mrb[11].mxu1 }
 0x1ac   : > { %v1848_v24 = vrot.slane %v1840_v15, %v3605_v42  ;;  %v2060_v26 = vcombine.low %v2052_v19, %v2059_v20  ;;  %v1855_v27 = vrot.slane %v1841_v21, %v3605_v42 }
 0x1ae   : > { %2142 = vst [vmem:[%s3619_s21] sm:$0xff] %v2060_v26  ;;  %v1856_v28 = vcombine.low %v1848_v24, %v1855_v27 }
 0x1b0   : > { %v1054_v30 = vpop.f32.mrb[12].mxu0  ;;  %v1095_v31 = vpop.f32.mrb[12].mxu1  ;;  %v2024_v6 = vadd.f32 %v1856_v28, %v471_v36  ;;  %v466_v36 = vld [vmem:[%s3469_s22 + $0x18] sm:$0xff] }
 0x1b1   : > { %v1056_v32 = vpop.f32.mrb[13].mxu0  ;;  %v1097_v34 = vpop.f32.mrb[13].mxu1 }
 0x1b2   : > { %v1857_v33 = vcombine.low %v1054_v30, %v1056_v32  ;;  %v1058_v35 = vpop.f32.mrb[14].mxu0  ;;  %v1858_v37 = vcombine.low %v1095_v31, %v1097_v34  ;;  %v1099_v39 = vpop.f32.mrb[14].mxu1  ;;  %v2067_v53 = vrot.slane %v2024_v6, %v3612_v9 }
 0x1b3   : > { %v1059_v40 = vpop.f32.mrb[15].mxu0  ;;  %v1100_v43 = vpop.f32.mrb[15].mxu1 }
 0x1b4   : > { %v1865_v41 = vrot.slane %v1857_v33, %v3605_v42  ;;  %v1872_v45 = vrot.slane %v1858_v37, %v3605_v42 }
 0x1b6   : > { %v1873_v46 = vcombine.low %v1865_v41, %v1872_v45  ;;  %v475_v45 = vunpack.c.l.bf16 %v466_v36 }
 0x1b8   : > { %v1136_v47 = vpop.f32.mrb[16].mxu0  ;;  %v2025_v48 = vadd.f32 %v1873_v46, %v472_v44  ;;  %v1177_v49 = vpop.f32.mrb[16].mxu1 }
 0x1b9   : > { %v1138_v17 = vpop.f32.mrb[17].mxu0  ;;  %v1179_v51 = vpop.f32.mrb[17].mxu1 }
 0x1ba   : > { %v1874_v50 = vcombine.low %v1136_v47, %v1138_v17  ;;  %v1140_v52 = vpop.f32.mrb[18].mxu0  ;;  %v2074_v54 = vrot.slane %v2025_v48, %v3612_v9  ;;  %v1875_v55 = vcombine.low %v1177_v49, %v1179_v51  ;;  %v1181_v56 = vpop.f32.mrb[18].mxu1  ;;  %v476_v17 = vunpack.c.h.bf16 %v466_v36 }
 0x1bb   : > { %v1141_v57 = vpop.f32.mrb[19].mxu0  ;;  %v1182_v59 = vpop.f32.mrb[19].mxu1 }
 0x1bc   : > { %v1882_v58 = vrot.slane %v1874_v50, %v3605_v42  ;;  %v2075_v60 = vcombine.low %v2067_v53, %v2074_v54  ;;  %v1889_v61 = vrot.slane %v1875_v55, %v3605_v42 }
 0x1be   : > { %2143 = vst [vmem:[%s3619_s21 + $0x8] sm:$0xff] %v2075_v60  ;;  %v1890_v62 = vcombine.low %v1882_v58, %v1889_v61 }
 0x1c0   : > { %v1218_v0 = vpop.f32.mrb[20].mxu0  ;;  %v1259_v1 = vpop.f32.mrb[20].mxu1  ;;  %v2026_v16 = vadd.f32 %v1890_v62, %v473_v7  ;;  %v467_v7 = vld [vmem:[%s3469_s22 + $0x20] sm:$0xff] }
 0x1c1   : > { %v1220_v2 = vpop.f32.mrb[21].mxu0  ;;  %v1261_v4 = vpop.f32.mrb[21].mxu1 }
 0x1c2   : > { %v1891_v3 = vcombine.low %v1218_v0, %v1220_v2  ;;  %v1222_v5 = vpop.f32.mrb[22].mxu0  ;;  %v1892_v8 = vcombine.low %v1259_v1, %v1261_v4  ;;  %v1263_v10 = vpop.f32.mrb[22].mxu1  ;;  %v2082_v26 = vrot.slane %v2026_v16, %v3612_v9 }
 0x1c3   : > { %v1223_v11 = vpop.f32.mrb[23].mxu0  ;;  %v1264_v13 = vpop.f32.mrb[23].mxu1 }
 0x1c4   : > { %v1899_v12 = vrot.slane %v1891_v3, %v3605_v42  ;;  %v1906_v15 = vrot.slane %v1892_v8, %v3605_v42 }
 0x1c6   : > { %v1907_v18 = vcombine.low %v1899_v12, %v1906_v15  ;;  %v477_v15 = vunpack.c.l.bf16 %v467_v7 }
 0x1c8   : > { %v1300_v19 = vpop.f32.mrb[24].mxu0  ;;  %v2027_v20 = vadd.f32 %v1907_v18, %v474_v14  ;;  %v1341_v21 = vpop.f32.mrb[24].mxu1 }
 0x1c9   : > { %v1302_v22 = vpop.f32.mrb[25].mxu0  ;;  %v1343_v24 = vpop.f32.mrb[25].mxu1 }
 0x1ca   : > { %v1908_v23 = vcombine.low %v1300_v19, %v1302_v22  ;;  %v1304_v25 = vpop.f32.mrb[26].mxu0  ;;  %v2089_v27 = vrot.slane %v2027_v20, %v3612_v9  ;;  %v1909_v28 = vcombine.low %v1341_v21, %v1343_v24  ;;  %v1345_v29 = vpop.f32.mrb[26].mxu1  ;;  %v478_v22 = vunpack.c.h.bf16 %v467_v7  ;;  %v2870_v7 = vld [vmem:[#allocation6 + $0x20] ss:$12 sps:$4 sm:$0xff] (!%p3924_p7)  }
 0x1cb   : > { %v1305_v30 = vpop.f32.mrb[27].mxu0  ;;  %v1346_v32 = vpop.f32.mrb[27].mxu1 }
 0x1cc   : > { %v1916_v31 = vrot.slane %v1908_v23, %v3605_v42  ;;  %v2090_v33 = vcombine.low %v2082_v26, %v2089_v27  ;;  %v1923_v34 = vrot.slane %v1909_v28, %v3605_v42 }
 0x1ce   : > { %2144 = vst [vmem:[%s3619_s21 + $0x10] sm:$0xff] %v2090_v33  ;;  %v1924_v35 = vcombine.low %v1916_v31, %v1923_v34 }
 0x1d0   : > { %v1382_v37 = vpop.f32.mrb[28].mxu0  ;;  %v1423_v39 = vpop.f32.mrb[28].mxu1  ;;  %v2028_v51 = vadd.f32 %v1924_v35, %v475_v45  ;;  %v468_v45 = vld [vmem:[%s3469_s22 + $0x28] sm:$0xff]  ;;  %s3709_s22 = sld [smem:[#allocation11 + $0x5]] (!%p3924_p7) }
 0x1d1   : > { %v1384_v40 = vpop.f32.mrb[29].mxu0  ;;  %v1425_v43 = vpop.f32.mrb[29].mxu1 }
 0x1d2   : > { %v1925_v41 = vcombine.low %v1382_v37, %v1384_v40  ;;  %v1386_v44 = vpop.f32.mrb[30].mxu0  ;;  %v1926_v6 = vcombine.low %v1423_v39, %v1425_v43  ;;  %v1427_v46 = vpop.f32.mrb[30].mxu1  ;;  %v2097_v60 = vrot.slane %v2028_v51, %v3612_v9 }
 0x1d3   : > { %v1387_v47 = vpop.f32.mrb[31].mxu0  ;;  %v1428_v49 = vpop.f32.mrb[31].mxu1 }
 0x1d4   : > { %v1933_v48 = vrot.slane %v1925_v41, %v3605_v42  ;;  %v1940_v50 = vrot.slane %v1926_v6, %v3605_v42 }
 0x1d6   : > { %v1941_v52 = vcombine.low %v1933_v48, %v1940_v50  ;;  %v479_v50 = vunpack.c.l.bf16 %v468_v45 }
 0x1d8   : > { %v1464_v53 = vpop.f32.mrb[32].mxu0  ;;  %v2029_v54 = vadd.f32 %v1941_v52, %v476_v17  ;;  %v1505_v55 = vpop.f32.mrb[32].mxu1 }
 0x1d9   : > { %v1466_v56 = vpop.f32.mrb[33].mxu0  ;;  %v1507_v58 = vpop.f32.mrb[33].mxu1 }
 0x1da   : > { %v1942_v57 = vcombine.low %v1464_v53, %v1466_v56  ;;  %v1468_v59 = vpop.f32.mrb[34].mxu0  ;;  %v2104_v61 = vrot.slane %v2029_v54, %v3612_v9  ;;  %v1943_v62 = vcombine.low %v1505_v55, %v1507_v58  ;;  %v1509_v63 = vpop.f32.mrb[34].mxu1  ;;  %v480_v56 = vunpack.c.h.bf16 %v468_v45 }
 0x1db   : > { %v1469_v0 = vpop.f32.mrb[35].mxu0  ;;  %v1510_v2 = vpop.f32.mrb[35].mxu1  ;;  %v2398_v45 = vstv (!%p3924_p7), %s3687_s28 }
 0x1dc   : > { %v1950_v1 = vrot.slane %v1942_v57, %v3605_v42  ;;  %v2105_v3 = vcombine.low %v2097_v60, %v2104_v61  ;;  %v1957_v4 = vrot.slane %v1943_v62, %v3605_v42  ;;  %v2863_v0 = vld [vmem:[#allocation6 + $0x4] ss:$12 sps:$4 sm:$0xff] (!%p3924_p7)   ;;  %v2865_v2 = vld [vmem:[#allocation6] ss:$12 sps:$4 sm:$0xff] (!%p3924_p7)  }
 0x1dd   : > { %2198 = vmatprep.subr.bf16.mxu0 (!%p3924_p7), %v2863_v0 }
 0x1de   : > { %2145 = vst [vmem:[%s3619_s21 + $0x18] sm:$0xff] %v2105_v3  ;;  %v1958_v5 = vcombine.low %v1950_v1, %v1957_v4  ;;  %v3176_v1 = vmov (!%p3924_p7), 0.0   ;;  %v3177_v3 = vmov (!%p3924_p7), 0   ;;  %2199 = vmatpush1.bf16.msra.mxu0 (!%p3924_p7), %v2865_v2  ;;  %v2867_v4 = vld [vmem:[#allocation6 + $0x1c] ss:$12 sps:$4 sm:$0xff] (!%p3924_p7)  }
 0x1df   : > { %2735 = vmatprep.subr.bf16.mxu1 (!%p3924_p7), %v3176_v1  ;;  %2230 = vmatprep.mubr.bf16.mxu0 (!%p3924_p7), %v3177_v3 }
 0x1e0   : > { %v1546_v8 = vpop.f32.mrb[36].mxu0  ;;  %v1587_v10 = vpop.f32.mrb[36].mxu1  ;;  %v2030_v24 = vadd.f32 %v1958_v5, %v477_v15  ;;  %v2869_v5 = vld [vmem:[#allocation6 + $0x18] ss:$12 sps:$4 sm:$0xff] (!%p3924_p7)   ;;  %2739 = vmatprep.mubr.msk.bf16.mxu1 (!%p3924_p7), %vm3178_vm1, %v3176_v1  ;;  %2200 = vmatprep.subr.bf16.mxu0 (!%p3924_p7), %v2867_v4 }
 0x1e1   : > { %v1548_v11 = vpop.f32.mrb[37].mxu0  ;;  %v1589_v13 = vpop.f32.mrb[37].mxu1 }
 0x1e2   : > { %v1959_v12 = vcombine.low %v1546_v8, %v1548_v11  ;;  %v1550_v14 = vpop.f32.mrb[38].mxu0  ;;  %v1960_v16 = vcombine.low %v1587_v10, %v1589_v13  ;;  %v1591_v18 = vpop.f32.mrb[38].mxu1  ;;  %v2112_v33 = vrot.slane %v2030_v24, %v3612_v9  ;;  %2201 = vmatpush1.bf16.msra.mxu0 (!%p3924_p7), %v2869_v5  ;;  %v2153_v8 = vld [vmem:[#allocation2] sm:$0x1] (!%p3924_p7) }
 0x1e3   : > { %v1551_v19 = vpop.f32.mrb[39].mxu0  ;;  %v1592_v21 = vpop.f32.mrb[39].mxu1 }
 0x1e4   : > { %v1967_v20 = vrot.slane %v1959_v12, %v3605_v42  ;;  %v1974_v23 = vrot.slane %v1960_v16, %v3605_v42 }
 0x1e5   : > { %2697 = vmatmul.mubr.msk.bf16.vlgmr.msra.gmra.mrb[0].mxu0 (!%p3924_p7), %vm2194_vm2, %v2153_v8 }
 0x1e6   : > { %v1975_v25 = vcombine.low %v1967_v20, %v1974_v23  ;;  %v2152_v23 = vld [vmem:[%s3861_s2] sm:$0x7] (!%p3924_p7) }
 0x1e8   : > { %v1628_v26 = vpop.f32.mrb[40].mxu0  ;;  %v2031_v27 = vadd.f32 %v1975_v25, %v478_v22  ;;  %v1669_v28 = vpop.f32.mrb[40].mxu1 }
 0x1e9   : > { %v1630_v29 = vpop.f32.mrb[41].mxu0  ;;  %v1671_v31 = vpop.f32.mrb[41].mxu1 }
 0x1ea   : > { %v1976_v30 = vcombine.low %v1628_v26, %v1630_v29  ;;  %v1632_v32 = vpop.f32.mrb[42].mxu0  ;;  %v2119_v34 = vrot.slane %v2031_v27, %v3612_v9  ;;  %v1977_v35 = vcombine.low %v1669_v28, %v1671_v31  ;;  %v1673_v36 = vpop.f32.mrb[42].mxu1  ;;  %v2308_v26 = vstv (!%p3924_p7), %s3662_s30  ;;  %s3717_s30 = sld [smem:[#allocation11 + $0xf]] (!%p3924_p7) }
 0x1eb   : > { %v1633_v37 = vpop.f32.mrb[43].mxu0  ;;  %v1674_v40 = vpop.f32.mrb[43].mxu1  ;;  %v2311_v27 = vstv (!%p3924_p7), %s3669_s9  ;;  %v2329_v28 = vstv (!%p3924_p7), %s3665_s20  ;;  %v2332_v29 = vstv (!%p3924_p7), %s3671_s26  ;;  %v2341_v32 = vstv (!%p3924_p7), %s3667_s12  ;;  %s3720_s20 = sld [smem:[#allocation11 + $0x4]] (!%p3924_p7)  ;;  %s3722_s12 = sld [smem:[#allocation11 + $0x8]] (!%p3924_p7) }
 0x1ec   : > { %v1984_v39 = vrot.slane %v1976_v30, %v3605_v42  ;;  %v2120_v41 = vcombine.low %v2112_v33, %v2119_v34  ;;  %v1991_v43 = vrot.slane %v1977_v35, %v3605_v42  ;;  %v2344_v33 = vstv (!%p3924_p7), %s3676_s13  ;;  %s3734_s9 = sld [smem:[#allocation11 + $0x2]] (!%p3924_p7)  ;;  %s3737_s26 = sld [smem:[#allocation11 + $0x6]] (!%p3924_p7) }
 0x1ed   : > { %v2318_v34 = vstv (!%p3924_p7), %s3674_s25  ;;  %v2348_v35 = vstv (!%p3924_p7), %s3680_s23  ;;  %s3739_s25 = sld [smem:[#allocation11 + $0xa]] (!%p3924_p7)  ;;  %s2709_s13 = sld [smem:[#allocation11 + $0x3]] (!%p3924_p7) }
 0x1ee   : > { %2146 = vst [vmem:[%s3619_s21 + $0x20] sm:$0xff] %v2120_v41  ;;  %v1992_v44 = vcombine.low %v1984_v39, %v1991_v43  ;;  %s2717_s23 = sld [smem:[#allocation11 + $0xb]] (!%p3924_p7) }
 0x1f0   : > { %v1710_v6 = vpop.f32.mrb[44].mxu0  ;;  %v1751_v46 = vpop.f32.mrb[44].mxu1  ;;  %v2032_v58 = vadd.f32 %v1992_v44, %v479_v50  ;;  %v2395_v44 = vstv (!%p3924_p7), %s3685_s27 }
 0x1f1   : > { %v1712_v47 = vpop.f32.mrb[45].mxu0  ;;  %v1753_v49 = vpop.f32.mrb[45].mxu1  ;;  %v2381_v0 = vstv (!%p3924_p7), %s3722_s12 }
 0x1f2   : > { %v1993_v48 = vcombine.low %v1710_v6, %v1712_v47  ;;  %v1714_v17 = vpop.f32.mrb[46].mxu0  ;;  %v1994_v51 = vcombine.low %v1751_v46, %v1753_v49  ;;  %v1755_v52 = vpop.f32.mrb[46].mxu1  ;;  %v2127_v61 = vrot.slane %v2032_v58, %v3612_v9  ;;  %v2384_v58 = vstv (!%p3924_p7), %s3711_s24 }
 0x1f3   : > { %v1715_v53 = vpop.f32.mrb[47].mxu0  ;;  %v1756_v55 = vpop.f32.mrb[47].mxu1 }
 0x1f4   : > { %v2001_v54 = vrot.slane %v1993_v48, %v3605_v42  ;;  %v2008_v57 = vrot.slane %v1994_v51, %v3605_v42  ;;  %v2866_v42 = vld [vmem:[#allocation6 + $0x8] ss:$12 sps:$4 sm:$0xff] (!%p3924_p7)   ;;  %v2402_v53 = vstv (!%p3924_p7), %s3692_s19 }
 0x1f5   : > { %2736 = vmatpush3.bf16.msra.mxu1 (!%p3924_p7), %v2866_v42 }
 0x1f6   : > { %v2009_v59 = vcombine.low %v2001_v54, %v2008_v57  ;;  %2737 = vmatprep.subr.bf16.mxu1 (!%p3924_p7), %v3176_v1  ;;  %v2370_v57 = vstv (!%p3924_p7), %s3709_s22 }
 0x1f8   : > { %v2033_v60 = vadd.f32 %v2009_v59, %v480_v56  ;;  %2151 = sbr.rel (%p3924_p7) target bundleno = 754 (0x2f2), region = 80  ;;  %v2356_v56 = vstv (!%p3924_p7), %s3704_s0 }
 0x1f9   : > { %2738 = vmatpush3.bf16.msra.mxu1 (!%p3924_p7), %v2870_v7 }
 0x1fa   : > { %v2134_v62 = vrot.slane %v2033_v60, %v3612_v9 }
 0x1fc   : > { %v2135_v63 = vcombine.low %v2127_v61, %v2134_v62  ;;  %2740 = vmatmul.mubr.msk.bf16.vlgmr.msra.gmra.mrb[0].mxu1 (!%p3924_p7), %vm2194_vm2, %v2153_v8  ;;  %v2406_v61 = vstv (!%p3924_p7), %s3717_s30  ;;  %v2353_v62 = vstv (!%p3924_p7), %s3715_s4 }
 0x1fe   : > { %2147 = vst [vmem:[%s3619_s21 + $0x28] sm:$0xff] %v2135_v63  ;;  %v2367_v63 = vstv (!%p3924_p7), %s3720_s20 }
 0x2b8   : > { %v2232_v10 = vpop.f32.mrb[0].mxu0 }
 0x2b9   : > { %v2234_v12 = vpop.f32.mrb[1].mxu0 }
 0x2ba   : > { %v2282_v14 = vcombine.low %v2232_v10, %v2234_v12  ;;  %v2236_v16 = vpop.f32.mrb[2].mxu0  ;;  %v2360_v10 = vstv %s3734_s9  ;;  %v2388_v12 = vstv %s3739_s25 }
 0x2bb   : > { %v2237_v19 = vpop.f32.mrb[3].mxu0 }
 0x2bc   : > { %v2289_v20 = vrot.slane %v2282_v14, %v3612_v9 }
 0x2cf   : > { %v2273_v11 = vpop.f32.mrb[0].mxu1 }
 0x2d0   : > { %v2296_v13 = vrot.slane %v2273_v11, %v3612_v9  ;;  %v2741_v15 = vpop.f32.mrb[1].mxu1  ;;  %v2374_v11 = vstv %s3737_s26 }
 0x2d1   : > { %v2276_v18 = vpop.f32.mrb[2].mxu1 }
 0x2d2   : > { %v2742_v21 = vpop.f32.mrb[3].mxu1  ;;  %v2297_v22 = vcombine.low %v2289_v20, %v2296_v13 }
 0x2d4   : > { %v2304_v24 = vrot.slane %v2297_v22, %v3612_v9  ;;  %v2336_v9 = vstv %s3678_s10  ;;  %s2713_s10 = sld [smem:[#allocation11 + $0x7]] }
 0x2d6   : > { %v3690_v25 = vadd.f32 %v2304_v24, %v2152_v23  ;;  %v2364_v23 = vstv %s2709_s13 }
 0x2d8   : > { %v2313_v30 = vrot.slane %v3690_v25, 1  ;;  %v3700_v31 = vrot.slane %v3690_v25, 2  ;;  %v2309_v36 = vmul.f32 %v2308_v26, %v3690_v25  ;;  %v2330_v39 = vmul.f32 %v2329_v28, %v3690_v25 }
 0x2d9   : > { %v2342_v41 = vmul.f32 %v2341_v32, %v3690_v25  ;;  %v2396_v38 = vmul.f32 %v2395_v44, %v3690_v25  ;;  %v2354_v5 = vmul.f32 %v2353_v62, %v3690_v25  ;;  %v2368_v7 = vmul.f32 %v2367_v63, %v3690_v25 }
 0x2da   : > { %v2315_v37 = vmul.f32 %v2313_v30, %v2311_v27  ;;  %v2333_v40 = vmul.f32 %v2332_v29, %v2313_v30  ;;  %v2345_v43 = vmul.f32 %v2344_v33, %v2313_v30  ;;  %v2321_v46 = vmul.f32 %v3700_v31, %v2318_v34 }
 0x2db   : > { %v2337_v48 = vmul.f32 %v2336_v9, %v3700_v31  ;;  %v2349_v50 = vmul.f32 %v2348_v35, %v3700_v31  ;;  %v2399_v55 = vmul.f32 %v2398_v45, %v2313_v30  ;;  %v2403_v60 = vmul.f32 %v2402_v53, %v3700_v31 }
 0x2dc   : > { %v2316_v6 = vadd.f32 %v2315_v37, %v2309_v36  ;;  %v2334_v47 = vadd.f32 %v2333_v40, %v2330_v39  ;;  %v2346_v17 = vadd.f32 %v2345_v43, %v2342_v41  ;;  %v2357_v2 = vmul.f32 %v2356_v56, %v2313_v30 }
 0x2dd   : > { %v2400_v59 = vadd.f32 %v2399_v55, %v2396_v38  ;;  %v2371_v3 = vmul.f32 %v2370_v57, %v2313_v30  ;;  %v2385_v42 = vmul.f32 %v2384_v58, %v2313_v30  ;;  %v2382_v8 = vmul.f32 %v2381_v0, %v3690_v25 }
 0x2de   : > { %v2322_v51 = vadd.f32 %v2321_v46, %v2316_v6  ;;  %v2338_v52 = vadd.f32 %v2337_v48, %v2334_v47  ;;  %v2350_v54 = vadd.f32 %v2349_v50, %v2346_v17  ;;  %v2358_v13 = vadd.f32 %v2357_v2, %v2354_v5 }
 0x2df   : > { %v2404_v1 = vadd.f32 %v2403_v60, %v2400_v59  ;;  %v2372_v14 = vadd.f32 %v2371_v3, %v2368_v7  ;;  %v2386_v15 = vadd.f32 %v2385_v42, %v2382_v8  ;;  %v2361_v16 = vmul.f32 %v2360_v10, %v3700_v31 }
 0x2e0   : > { %2327 = vst.msk [vmem:[#allocation13] sm:$0x1] %vm3729_vm3, %v2322_v51  ;;  %2339 = vst.msk [vmem:[#allocation13 + $0x1] sm:$0x1] %vm3729_vm3, %v2338_v52  ;;  %v2375_v18 = vmul.f32 %v2374_v11, %v3700_v31  ;;  %v2389_v19 = vmul.f32 %v2388_v12, %v3700_v31  ;;  %v2378_v24 = vstv %s2713_s10  ;;  %v2392_v26 = vstv %s2717_s23 }
 0x2e1   : > { %2351 = vst.msk [vmem:[#allocation13 + $0x2] sm:$0x1] %vm3729_vm3, %v2350_v54  ;;  %v2407_v4 = vadd.f32 %v2406_v61, %v2404_v1  ;;  %v2362_v20 = vadd.f32 %v2361_v16, %v2358_v13 }
 0x2e2   : > { %v2376_v21 = vadd.f32 %v2375_v18, %v2372_v14  ;;  %v2390_v22 = vadd.f32 %v2389_v19, %v2386_v15 }
 0x2e3   : > { %2871 = vrcp.f32 %v2407_v4  ;;  %v2365_v25 = vadd.f32 %v2364_v23, %v2362_v20 }
 0x2e4   : > { %v2379_v27 = vadd.f32 %v2378_v24, %v2376_v21  ;;  %v2393_v28 = vadd.f32 %v2392_v26, %v2390_v22 }
 0x2ed   : > { %v2872_v29 = vpop.eup %2871 }
 0x2ee   : > { %v2409_v30 = vmul.f32 %v2872_v29, %v2365_v25  ;;  %v2411_v32 = vmul.f32 %v2872_v29, %v2379_v27  ;;  %v2413_v33 = vmul.f32 %v2872_v29, %v2393_v28 }
 0x2f0   : > { %2410 = vst.msk [vmem:[#allocation14] sm:$0x1] %vm3729_vm3, %v2409_v30  ;;  %2412 = vst.msk [vmem:[#allocation14 + $0x1] sm:$0x1] %vm3729_vm3, %v2411_v32 }
 0x2f1   : > { %2414 = vst.msk [vmem:[#allocation14 + $0x2] sm:$0x1] %vm3729_vm3, %v2413_v33 }
 0x2f2 PF: > { %s3179_s18 = smov [#allocation13]   ;;  %s3180_s27 = smov [#allocation14]  }
 0x2f3   : > { %s2427_s29 = sshll.u32 %s3179_s18, 4  ;;  %s2438_s28 = sshll.u32 %s3180_s27, 4  ;;  %s2428_s29 = int_to_ptr.vmem [resolvable:$true] %s2427_s29  ;;  %s2439_s28 = int_to_ptr.vmem [resolvable:$true] %s2438_s28 }
 0x2f4   : > { %s3019_s19 = scalar_lea.vmem %s2428_s29, 48  ;;  %p3927_p0 = scmp.eq.s32.totalorder %s3256_s17, 1 }
 0x2f5   : > { %p3020_p6 = scmp.ne.s32.totalorder %s2428_s29, %s3019_s19  ;;  %s3025_s0 = scalar_lea.vmem %s2428_s29, 64 }
 0x2f6   : > { %p3026_p11 = scmp.lt.s32.totalorder %s2428_s29, %s2428_s29  ;;  %p3027_p1 = scmp.lt.s32.totalorder %s3025_s0, %s3019_s19 }
 0x2f7   : > { %p3021_p10 = pnand %p3020_p6, %p3927_p0 }
 0x2f8   : > { %p3028_p3 = por %p3027_p1, %p3026_p11 }
 0x2f9   : > { %p3022_p9 = pneg %p3021_p10 }
 0x2fb   : > { %p3029_p8 = pnand %p3028_p3, %p3022_p9 }
 0x2fd   : > { %3032 = shalt.err (!%p3029_p8)
}
 0x2fe   : > { %s3033_s4 = scalar_lea.hbm %s3867_s8, 48  ;;  %p3928_p5 = pmov %p3927_p0 }
 0x2ff   : > { %p3034_p12 = scmp.ne.s32.totalorder %s3867_s8, %s3033_s4  ;;  %p3039_p4 = scmp.lt.u32.totalorder %s3033_s4, %s3867_s8 }
 0x301   : > { %p3035_p2 = pnand %p3034_p12, %p3928_p5 }
 0x303   : > { %p3036_p13 = pneg %p3035_p2 }
 0x305   : > { %p3041_p7 = pnand %p3039_p4, %p3036_p13 }
 0x307   : > { %3044 = shalt.err (!%p3041_p7)
}
 0x308   : > { %p3929_p6 = pmov %p3927_p0  ;;  %s3045_s13 = scalar_lea.vmem %s2439_s28, 48 }
 0x309   : > { %p3046_p0 = scmp.ne.s32.totalorder %s2439_s28, %s3045_s13  ;;  %p3930_p10 = pmov %p3928_p5 }
 0x30a   : > { %2768 = dma.vmem_to_hbm [thread:$0]  (%p3929_p6), %s2428_s29, 48, %s3867_s8, [#allocation4]  }
 0x30b   : > { %p3047_p9 = pnand %p3046_p0, %p3930_p10  ;;  %s3051_s10 = scalar_lea.vmem %s2439_s28, 64 }
 0x30c   : > { %p3052_p1 = scmp.lt.s32.totalorder %s2439_s28, %s2439_s28  ;;  %p3053_p3 = scmp.lt.s32.totalorder %s3051_s10, %s3045_s13 }
 0x30d   : > { %p3048_p11 = pneg %p3047_p9 }
 0x30e   : > { %p3054_p8 = por %p3053_p3, %p3052_p1 }
 0x310   : > { %p3055_p12 = pnand %p3054_p8, %p3048_p11 }
 0x312   : > { %3058 = shalt.err (!%p3055_p12)
}
 0x313   : > { %s3931_s27 = sld [smem:[#allocation31_spill]]  ;;  %p3932_p2 = pmov %p3929_p6 }
 0x319   : > { %s3059_s19 = scalar_lea.hbm %s3931_s27, 48 }
 0x31a   : > { %p3060_p5 = scmp.ne.s32.totalorder %s3931_s27, %s3059_s19  ;;  %p3065_p7 = scmp.lt.u32.totalorder %s3059_s19, %s3931_s27 }
 0x31c   : > { %p3061_p13 = pnand %p3060_p5, %p3932_p2 }
 0x31e   : > { %p3062_p4 = pneg %p3061_p13 }
 0x320   : > { %p3067_p6 = pnand %p3065_p7, %p3062_p4 }
 0x322   : > { %3070 = shalt.err (!%p3067_p6)
}
 0x323   : > { %p3933_p0 = pmov %p3932_p2  ;;  %s3934_s20 = sld [smem:[#allocation27_spill]] }
 0x324   : > { %s2731_s12 = smul.u32 768, %s3256_s17  ;;  %s2452_s9 = sshll.u32 %s3619_s21, 4  ;;  %s3809_s9 = int_to_ptr.vmem [resolvable:$true] %s2452_s9 }
 0x325   : > { %2770 = dma.vmem_to_hbm [thread:$0]  (%p3933_p0), %s2439_s28, 48, %s3931_s27, [#allocation15]  }
 0x326   : > { %s3935_s13 = sld [smem:[#allocation32_spill]]  ;;  %s2416_s18 = scalar_lea.sflag [#allocation4], %s395_s11 }
 0x327   : > { %s3071_s19 = scalar_lea.vmem %s3809_s9, 768  ;;  %s3181_s0 = smov [#allocation16]  }
 0x328   : > { %p3072_p10 = scmp.ne.s32.totalorder %s3809_s9, %s3071_s19  ;;  %s3075_s28 = sshll.u32 %s3181_s0, 4  ;;  %s3076_s28 = int_to_ptr.vmem [resolvable:$false] %s3075_s28 }
 0x329   : > { %p3937_p9 = scmp.ne.s32.totalorder %s3934_s20, 0  ;;  %s3077_s21 = scalar_lea.vmem %s3076_s28, 1536 }
 0x32a   : > { %p3078_p3 = scmp.lt.s32.totalorder %s3809_s9, %s3076_s28  ;;  %p3079_p8 = scmp.lt.s32.totalorder %s3077_s21, %s3071_s19 }
 0x32b   : > { %p3073_p11 = pnand %p3072_p10, %p3937_p9 }
 0x32c   : > { %s3936_s10 = smov %s3935_s13  ;;  %s2450_s23 = scalar_lea.hbm %s3935_s13, %s2731_s12 }
 0x32d   : > { %p3074_p1 = pneg %p3073_p11  ;;  %p3080_p12 = por %p3079_p8, %p3078_p3 }
 0x32f   : > { %p3081_p5 = pnand %p3080_p12, %p3074_p1 }
 0x331   : > { %3084 = shalt.err (!%p3081_p5)
}
 0x332   : > { %s3085_s22 = scalar_lea.hbm %s2450_s23, 768  ;;  %s3089_s24 = scalar_lea.hbm %s3936_s10, 1536 }
 0x333   : > { %p3086_p2 = scmp.ne.s32.totalorder %s2450_s23, %s3085_s22  ;;  %p3090_p7 = scmp.lt.u32.totalorder %s2450_s23, %s3936_s10 }
 0x334   : > { %p3091_p6 = scmp.lt.u32.totalorder %s3089_s24, %s3085_s22  ;;  %p3093_p10 = scmp.lt.u32.totalorder %s3085_s22, %s2450_s23 }
 0x335   : > { %p3087_p13 = pnand %p3086_p2, %p3937_p9 }
 0x336   : > { %p3092_p0 = por %p3091_p6, %p3090_p7 }
 0x337   : > { %p3088_p4 = pneg %p3087_p13 }
 0x338   : > { %p3094_p11 = por %p3093_p10, %p3092_p0 }
 0x33a   : > { %p3095_p1 = pnand %p3094_p11, %p3088_p4 }
 0x33c   : > { %3098 = shalt.err (!%p3095_p1)
}
 0x33d   : > { %2771 = dma.vmem_to_hbm [thread:$0]  (%p3937_p9), %s3809_s9, 768, %s2450_s23, %s2416_s18  }
 0x33e   : > { %p3938_p3 = scmp.eq.s32.totalorder %s3256_s17, 1 }
 0x340   : > { %3136 = dma.done.wait (%p3938_p3), [#allocation4], 48   ;;  %p3939_p8 = pmov %p3938_p3 }
 0x341   : > { %p3940_p12 = pmov %p3938_p3 }
 0x342   : > { %3138 = vsyncadd (%p3939_p8), [#allocation4], 4294967248 }
 0x343   : > { %3140 = dma.done.wait (%p3940_p12), [#allocation15], 48   ;;  %p3941_p5 = pmov %p3938_p3 }
 0x345   : > { %3142 = vsyncadd (%p3941_p5), [#allocation15], 4294967248 }
 0x346 PF: > { %s3942_s12 = sadd.s32 4294967294, %s3161_s16   ;;  %s3943_s26 = sld [smem:[#allocation28_spill]] }
 0x347   : > { %s2472_s20 = sand.u32 1, %s3942_s12   ;;  %p3945_p13 = scmp.ge.s32.totalorder %s3161_s16, 2 }
 0x348   : > { %s2473_s9 = scalar_lea.sflag [#allocation4], %s2472_s20 }
 0x34c   : > { %p3944_p2 = scmp.ne.s32.totalorder %s3943_s26, 0 }
 0x34e   : > { %p2798_p9 = pnand %p3945_p13, %p3944_p2 }
 0x350   : > { %3144 = dma.done.wait (!%p2798_p9), %s2473_s9, 768  }
 0x351   : > { %3146 = vsyncadd (!%p2798_p9), %s2473_s9, 4294966528  ;;  %s3946_s16 = sld [smem:[#allocation25_spill]]  ;;  %s3947_s25 = sld [smem:[#allocation26_spill]] }
 0x352   : > { %s3948_s13 = smov %s3153_s14  ;;  %s3949_s14 = smov %s3157_s15 }
 0x357   : > { %p24_p4 = scmp.ge.s32.totalorder %s3946_s16, 4   ;;  %s3950_s15 = smov %s3947_s25 }
 0x359   :  { %26 = sbr.rel (!%p24_p4) target bundleno = 12 (0xc), region = 143 }
 0x360   :  { %2478 = vsyncpa [#allocation3], 1 }
 0x361   :  { %2480 = vsyncpa [#allocation3 + $0x1], 1 }
 0x362   :  { %2481 = vsyncpa [#allocation7], 1 }
 0x363   :  { %2482 = vsyncpa [#allocation4], 1 }
 0x364   :  { %2484 = vsyncpa [#allocation4 + $0x1], 1 }
 0x365   :  { %2485 = vsyncpa [#allocation15], 1 }
 0x366   :  { %2486 = vsyncpa [#allocation5], 1 }
 0x367   :  { %2488 = vsyncpa [#allocation5 + $0x1], 1 }
 0x368   :  { %2489 = vsyncpa [#allocation12], 1 }

</bundles_post_ra>
